<compile_context>
chip_gen: v6e
topology: v6e:2x2x1
jax: 0.10.0
libtpu: 0.0.40
codegen_flags: <defaults>
</compile_context>

<pallas_src>
import functools

import jax
import jax.numpy as jnp
from jax.experimental import pallas as pl
from jax.experimental.pallas import tpu as pltpu


def _round_up(x, m):
    return ((x + m - 1) // m) * m


def _pad2d(x, rows, cols):
    return jnp.pad(x, ((0, rows - x.shape[0]), (0, cols - x.shape[1])))


def _vmem_capacity_bytes():
    try:
        return int(pltpu.get_tpu_info().vmem_capacity_bytes)
    except Exception:
        return 64 * 1024 * 1024  # conservative fallback (v7x per-TC VMEM)


_VMEM_CAP = _vmem_capacity_bytes()
# Generation-aware scoped-VMEM limit (~100 MiB on v5e/v6e, ~52 MiB on v7x).
_VMEM_LIMIT_BYTES = min(int(_VMEM_CAP * 0.80), 104 * 1024 * 1024)


# ---------------------------------------------------------------------------
# Kernel 1 (tiled path): per-layer feature transform  XW_scaled = (X @ W) * d
# ---------------------------------------------------------------------------
def _transform_kernel(x_ref, w_ref, d_ref, out_ref):
    x = x_ref[...].astype(jnp.bfloat16)
    xw = jnp.dot(x, w_ref[...], preferred_element_type=jnp.float32)
    out_ref[...] = (xw * d_ref[...]).astype(out_ref.dtype)


def gcn_transform(x, w, d_col, *, tile_m):
    n_p, f_in = x.shape
    f_out = w.shape[1]
    return pl.pallas_call(
        _transform_kernel,
        out_shape=jax.ShapeDtypeStruct((n_p, f_out), jnp.bfloat16),
        grid=(n_p // tile_m,),
        in_specs=[
            pl.BlockSpec((tile_m, f_in), lambda i: (i, 0)),
            pl.BlockSpec((f_in, f_out), lambda i: (0, 0)),
            pl.BlockSpec((tile_m, 1), lambda i: (i, 0)),
        ],
        out_specs=pl.BlockSpec((tile_m, f_out), lambda i: (i, 0)),
        compiler_params=pltpu.CompilerParams(
            dimension_semantics=("parallel",),
            vmem_limit_bytes=_VMEM_LIMIT_BYTES,
        ),
    )(x, w, d_col)


# ---------------------------------------------------------------------------
# Kernel 2 (tiled path): aggregation  out = relu?(d * (A @ XW_scaled) + b)
#   - A arrives as int8 {0,1}; cast to bf16 in-kernel (halves HBM traffic).
#   - XW is VMEM-resident (constant index_map); contraction chunk sliced with
#     pl.ds inside the kernel.  Falls back to streamed blocks for huge N.
# ---------------------------------------------------------------------------
def _aggregate_kernel(a_ref, xw_ref, d_ref, b_ref, out_ref, acc_ref, *,
                      apply_relu, tile_k, xw_resident):
    @pl.when(pl.program_id(1) == 0)
    def _():
        acc_ref[...] = jnp.zeros_like(acc_ref)

    a = a_ref[...].astype(jnp.bfloat16)
    if xw_resident:
        start = pl.multiple_of(pl.program_id(1) * tile_k, tile_k)
        xw = xw_ref[pl.ds(start, tile_k), :]
    else:
        xw = xw_ref[...]
    acc_ref[...] += jnp.dot(a, xw, preferred_element_type=jnp.float32)

    @pl.when(pl.program_id(1) == pl.num_programs(1) - 1)
    def _():
        h = acc_ref[...] * d_ref[...] + b_ref[...]
        if apply_relu:
            h = jnp.maximum(h, 0.0)
        out_ref[...] = h.astype(out_ref.dtype)


def gcn_aggregate(a, xw, d_col, b_row, *, tile_m, tile_k, apply_relu, out_dtype):
    n_p = a.shape[0]
    f_out = xw.shape[1]

    # XW (N x f_out bf16) is tiny relative to A; keep it fully VMEM-resident so
    # it is DMA'd once instead of once per row tile.
    xw_resident = (2 * n_p * f_out * xw.dtype.itemsize) <= int(0.25 * _VMEM_CAP)
    if xw_resident:
        xw_spec = pl.BlockSpec((n_p, f_out), lambda i, k: (0, 0))
    else:
        xw_spec = pl.BlockSpec((tile_k, f_out), lambda i, k: (k, 0))

    kernel = functools.partial(_aggregate_kernel, apply_relu=apply_relu,
                               tile_k=tile_k, xw_resident=xw_resident)
    return pl.pallas_call(
        kernel,
        out_shape=jax.ShapeDtypeStruct((n_p, f_out), out_dtype),
        grid=(n_p // tile_m, n_p // tile_k),
        in_specs=[
            pl.BlockSpec((tile_m, tile_k), lambda i, k: (i, k)),
            xw_spec,
            pl.BlockSpec((tile_m, 1), lambda i, k: (i, 0)),
            pl.BlockSpec((1, f_out), lambda i, k: (0, 0)),
        ],
        out_specs=pl.BlockSpec((tile_m, f_out), lambda i, k: (i, 0)),
        scratch_shapes=[pltpu.VMEM((tile_m, f_out), jnp.float32)],
        compiler_params=pltpu.CompilerParams(
            dimension_semantics=("parallel", "arbitrary"),
            vmem_limit_bytes=_VMEM_LIMIT_BYTES,
        ),
    )(a, xw, d_col, b_row)


# ---------------------------------------------------------------------------
# Kernel 3 (small/mid-N path): all layers fused in one pallas_call, H resident.
# A is DMA'd once (bf16) and reused for every layer.
# ---------------------------------------------------------------------------
def _fused_gcn_kernel(*refs, num_layers):
    a_ref, d_ref, x_ref = refs[0], refs[1], refs[2]
    wb_refs = refs[3:3 + 2 * num_layers]
    logits_ref = refs[3 + 2 * num_layers]
    sl_ref = refs[4 + 2 * num_layers]

    a = a_ref[...]        # bf16 (Np, Np), DMA'd once for all layers
    d = d_ref[...]        # f32  (Np, 1)
    h = x_ref[...]        # bf16 (Np, F0p)
    second_last = None
    logits = None
    for l in range(num_layers):          # static unroll at trace time
        w = wb_refs[2 * l][...]           # bf16
        b = wb_refs[2 * l + 1][...]       # f32 (1, Fp)
        xw = jnp.dot(h, w, preferred_element_type=jnp.float32) * d
        agg = jnp.dot(a, xw.astype(jnp.bfloat16),
                      preferred_element_type=jnp.float32)
        out = agg * d + b
        if l < num_layers - 1:
            out = jnp.maximum(out, 0.0)
            second_last = out
            h = out.astype(jnp.bfloat16)
        else:
            logits = out
    if num_layers == 1:
        second_last = logits
    logits_ref[...] = logits.astype(logits_ref.dtype)
    sl_ref[...] = second_last.astype(sl_ref.dtype)


def gcn_forward_fused(a_pad, d_col, x_pad, w_pads, b_pads, sl_dim_p):
    num_layers = len(w_pads)
    n_p = a_pad.shape[0]
    f_last_p = w_pads[-1].shape[1]

    inputs = [a_pad, d_col, x_pad]
    in_specs = [
        pl.BlockSpec((n_p, n_p), lambda i: (0, 0)),
        pl.BlockSpec((n_p, 1), lambda i: (0, 0)),
        pl.BlockSpec((n_p, x_pad.shape[1]), lambda i: (0, 0)),
    ]
    for w, b in zip(w_pads, b_pads):
        inputs += [w, b]
        in_specs += [
            pl.BlockSpec(w.shape, lambda i: (0, 0)),
            pl.BlockSpec(b.shape, lambda i: (0, 0)),
        ]

    kernel = functools.partial(_fused_gcn_kernel, num_layers=num_layers)
    logits_p, sl_p = pl.pallas_call(
        kernel,
        out_shape=(
            jax.ShapeDtypeStruct((n_p, f_last_p), jnp.float32),
            jax.ShapeDtypeStruct((n_p, sl_dim_p), jnp.float32),
        ),
        grid=(1,),
        in_specs=in_specs,
        out_specs=(
            pl.BlockSpec((n_p, f_last_p), lambda i: (0, 0)),
            pl.BlockSpec((n_p, sl_dim_p), lambda i: (0, 0)),
        ),
        compiler_params=pltpu.CompilerParams(
            dimension_semantics=("arbitrary",),
            vmem_limit_bytes=_VMEM_LIMIT_BYTES,
        ),
    )(*inputs)
    return logits_p, sl_p


# ---------------------------------------------------------------------------
# Parameter init + top-level forward
# ---------------------------------------------------------------------------
def glorot_uniform(key, shape):
    fan_in, fan_out = shape
    limit = jnp.sqrt(6.0 / (fan_in + fan_out))
    return jax.random.uniform(key, shape, jnp.float32, -limit, limit)


def init_gcn_params(key, dims):
    """dims = [d_data] + h_dims + [h_dims[-1]]; one (W, b) per layer."""
    params = []
    for l in range(len(dims) - 1):
        key, wk = jax.random.split(key)
        w = glorot_uniform(wk, (dims[l], dims[l + 1]))
        b = jnp.zeros((dims[l + 1],), jnp.float32)
        params.append((w, b))
    return params


def _fused_fits(n_p, f0_p):
    # Double-buffered bf16 A block + features/intermediates/outputs (rough upper
    # bound) must fit comfortably in VMEM.
    a_bytes = 2 * (n_p * n_p * 2)
    feat_bytes = n_p * (2 * f0_p + 24 * 128)
    return (a_bytes + feat_bytes) <= int(0.5 * _VMEM_CAP)


def gcn_forward(adj, features, params, *, fuse_layers=None):
    """Mirrors GCN.forward (eval mode). Returns (logits, second_last_h)."""
    n = adj.shape[0]
    num_layers = len(params)

    f0_p = _round_up(params[0][0].shape[0], 128)

    # ---- choose path (generation-aware via VMEM capacity) -------------------
    n_fused = _round_up(n, 256)
    if fuse_layers is None:
        fuse_layers = _fused_fits(n_fused, f0_p)

    if fuse_layers:
        n_p = n_fused
        tile_m = tile_k = tm_transform = None
        a_dtype = jnp.bfloat16      # A read once, reused for all layers
    else:
        n_p = _round_up(n, 512)      # padding decoupled from tile_k
        tile_m = 512
        tile_k = max(t for t in (2048, 1024, 512) if n_p % t == 0)
        tm_transform = 1024 if n_p % 1024 == 0 else 512
        a_dtype = jnp.int8           # {0,1} lossless; halves per-layer A traffic

    # ---- normalization folded into kernels: only d = D^-1/2 is needed -------
    adj_f32 = adj.astype(jnp.float32)
    deg = jnp.sum(adj_f32, axis=1)
    d_inv_sqrt = jnp.where(deg > 0, 1.0 / jnp.sqrt(jnp.maximum(deg, 1e-12)), 0.0)
    d_col = _pad2d(d_inv_sqrt[:, None].astype(jnp.float32), n_p, 1)

    a_pad = _pad2d(adj_f32, n_p, n_p).astype(a_dtype)

    x_pad = _pad2d(features.astype(jnp.float32), n_p, f0_p).astype(jnp.bfloat16)

    w_pads, b_pads = [], []
    for (w, b) in params:
        fi_p = _round_up(w.shape[0], 128)
        fo_p = _round_up(w.shape[1], 128)
        w_pads.append(_pad2d(w.astype(jnp.float32), fi_p, fo_p).astype(jnp.bfloat16))
        b_pads.append(_pad2d(b.reshape(1, -1).astype(jnp.float32), 1, fo_p))

    sl_dim = params[-1][0].shape[1] if num_layers == 1 else params[-2][0].shape[1]
    sl_dim_p = _round_up(sl_dim, 128)

    if fuse_layers:
        logits_p, sl_p = gcn_forward_fused(a_pad, d_col, x_pad, w_pads, b_pads,
                                           sl_dim_p)
    else:
        h = x_pad
        sl_p = None
        for l in range(num_layers):
            last = (l == num_layers - 1)
            # second_last_h kept in f32 (matches fused-path precision)
            out_dtype = (jnp.float32 if (last or l == num_layers - 2)
                         else jnp.bfloat16)
            xw = gcn_transform(h, w_pads[l], d_col, tile_m=tm_transform)
            h = gcn_aggregate(
                a_pad, xw, d_col, b_pads[l],
                tile_m=tile_m, tile_k=tile_k,
                apply_relu=not last,
                out_dtype=out_dtype,
            )
            if l == num_layers - 2:
                sl_p = h
        logits_p = h
        if num_layers == 1:
            sl_p = logits_p

    logits = logits_p[:n, :params[-1][0].shape[1]]
    second_last_h = sl_p[:n, :sl_dim].astype(jnp.float32)
    return logits, second_last_h


def _reference_forward(adj, features, params):
    """Plain-JAX f32 reference (DGL GraphConv norm='both', eval mode)."""
    deg = jnp.sum(adj, axis=1)
    dis = jnp.where(deg > 0, 1.0 / jnp.sqrt(jnp.maximum(deg, 1e-12)), 0.0)
    a_hat = dis[:, None] * adj * dis[None, :]
    h = features
    for (w, b) in params[:-1]:
        h = jnp.maximum(a_hat @ (h @ w) + b, 0.0)
    w, b = params[-1]
    logits = a_hat @ (h @ w) + b
    sl = logits if len(params) == 1 else h
    return logits, sl


if __name__ == "__main__":
    key = jax.random.PRNGKey(0)

    # Small config mirroring the module: d_data=32, GCN_args['h_dims']=[64, 64]
    # -> dims = [32, 64, 64, 64] -> 3 GraphConv layers.
    n_nodes = 128
    d_data = 32
    h_dims = [64, 64]
    dims = [d_data] + h_dims + [h_dims[-1]]

    key, k_feat, k_adj, k_params = jax.random.split(key, 4)

    features = jax.random.normal(k_feat, (n_nodes, d_data), jnp.float32)

    # Random symmetric binary adjacency with self-loops (no isolated nodes).
    a = (jax.random.uniform(k_adj, (n_nodes, n_nodes)) < 0.05).astype(jnp.float32)
    adj = jnp.clip(a + a.T + jnp.eye(n_nodes, dtype=jnp.float32), 0.0, 1.0)

    params = init_gcn_params(k_params, dims)

    # Small-N fused path (single pallas_call, A + H resident in VMEM).
    logits_fused, sl_fused = gcn_forward(adj, features, params, fuse_layers=True)
    # Tiled large-N path (int8 A, VMEM-resident XW, 512-wide tiles).
    logits_tiled, sl_tiled = gcn_forward(adj, features, params, fuse_layers=False)
    jax.block_until_ready((logits_fused, sl_fused, logits_tiled, sl_tiled))

    assert logits_fused.shape == (n_nodes, h_dims[-1])
    assert sl_fused.shape == (n_nodes, h_dims[-1])
    assert logits_tiled.shape == (n_nodes, h_dims[-1])
    assert sl_tiled.shape == (n_nodes, h_dims[-1])

    # Loose numerical check vs plain-JAX f32 reference (kernels use bf16 MXU inputs).
    ref_logits, ref_sl = _reference_forward(adj, features, params)
    assert bool(jnp.allclose(logits_fused, ref_logits, atol=0.1, rtol=0.1))
    assert bool(jnp.allclose(logits_tiled, ref_logits, atol=0.1, rtol=0.1))
    assert bool(jnp.allclose(sl_fused, ref_sl, atol=0.1, rtol=0.1))
    assert bool(jnp.allclose(sl_tiled, ref_sl, atol=0.1, rtol=0.1))

    print("KERNEL_OK")
</pallas_src>

<mosaic_0001>
module attributes {stable_mosaic.version = 11 : i64} {
  func.func @_fused_gcn_kernel(%arg0: i32, %arg1: memref<256x256xbf16, #tpu.memory_space<vmem>>, %arg2: memref<256x1xf32, #tpu.memory_space<vmem>>, %arg3: memref<256x128xbf16, #tpu.memory_space<vmem>>, %arg4: memref<128x128xbf16, #tpu.memory_space<vmem>>, %arg5: memref<1x128xf32, #tpu.memory_space<vmem>>, %arg6: memref<128x128xbf16, #tpu.memory_space<vmem>>, %arg7: memref<1x128xf32, #tpu.memory_space<vmem>>, %arg8: memref<128x128xbf16, #tpu.memory_space<vmem>>, %arg9: memref<1x128xf32, #tpu.memory_space<vmem>>, %arg10: memref<256x128xf32, #tpu.memory_space<vmem>>, %arg11: memref<256x128xf32, #tpu.memory_space<vmem>>) attributes {dimension_semantics = [#tpu.dimension_semantics<arbitrary>], iteration_bounds = array<i64: 1>, scalar_prefetch = 0 : i64, scratch_operands = 0 : i64, tpu.core_type = #tpu.core_type<tc>, window_params = [{pipeline_mode = #tpu.pipeline_mode<synchronous>, transform_indices = @transform_0, window_bounds = array<i64: 256, 256>}, {pipeline_mode = #tpu.pipeline_mode<synchronous>, transform_indices = @transform_1, window_bounds = array<i64: 256, 1>}, {pipeline_mode = #tpu.pipeline_mode<synchronous>, transform_indices = @transform_2, window_bounds = array<i64: 256, 128>}, {pipeline_mode = #tpu.pipeline_mode<synchronous>, transform_indices = @transform_3, window_bounds = array<i64: 128, 128>}, {pipeline_mode = #tpu.pipeline_mode<synchronous>, transform_indices = @transform_4, window_bounds = array<i64: 1, 128>}, {pipeline_mode = #tpu.pipeline_mode<synchronous>, transform_indices = @transform_5, window_bounds = array<i64: 128, 128>}, {pipeline_mode = #tpu.pipeline_mode<synchronous>, transform_indices = @transform_6, window_bounds = array<i64: 1, 128>}, {pipeline_mode = #tpu.pipeline_mode<synchronous>, transform_indices = @transform_7, window_bounds = array<i64: 128, 128>}, {pipeline_mode = #tpu.pipeline_mode<synchronous>, transform_indices = @transform_8, window_bounds = array<i64: 1, 128>}, {pipeline_mode = #tpu.pipeline_mode<synchronous>, transform_indices = @transform_9, window_bounds = array<i64: 256, 128>}, {pipeline_mode = #tpu.pipeline_mode<synchronous>, transform_indices = @transform_10, window_bounds = array<i64: 256, 128>}]} {
    %c0 = arith.constant 0 : index
    %c0_0 = arith.constant 0 : index
    %0 = vector.load %arg1[%c0, %c0_0] : memref<256x256xbf16, #tpu.memory_space<vmem>>, vector<256x256xbf16>
    %c0_1 = arith.constant 0 : index
    %c0_2 = arith.constant 0 : index
    %1 = vector.load %arg2[%c0_1, %c0_2] : memref<256x1xf32, #tpu.memory_space<vmem>>, vector<256x1xf32>
    %c0_3 = arith.constant 0 : index
    %c0_4 = arith.constant 0 : index
    %2 = vector.load %arg3[%c0_3, %c0_4] : memref<256x128xbf16, #tpu.memory_space<vmem>>, vector<256x128xbf16>
    %c0_5 = arith.constant 0 : index
    %c0_6 = arith.constant 0 : index
    %3 = vector.load %arg4[%c0_5, %c0_6] : memref<128x128xbf16, #tpu.memory_space<vmem>>, vector<128x128xbf16>
    %c0_7 = arith.constant 0 : index
    %c0_8 = arith.constant 0 : index
    %4 = vector.load %arg5[%c0_7, %c0_8] : memref<1x128xf32, #tpu.memory_space<vmem>>, vector<1x128xf32>
    %cst = arith.constant dense<0.000000e+00> : vector<256x128xf32>
    %5 = tpu.matmul %2, %3, %cst {dimension_numbers = #tpu.dot_dimension_numbers<[1], [0], [0], [1], [0, 0, 1, 1], [], []>} : vector<256x128xbf16>, vector<128x128xbf16>, vector<256x128xf32> -> vector<256x128xf32>
    %6 = vector.broadcast %1 : vector<256x1xf32> to vector<256x128xf32>
    %7 = arith.mulf %5, %6 : vector<256x128xf32>
    %8 = arith.truncf %7 : vector<256x128xf32> to vector<256x128xbf16>
    %cst_9 = arith.constant dense<0.000000e+00> : vector<256x128xf32>
    %9 = tpu.matmul %0, %8, %cst_9 {dimension_numbers = #tpu.dot_dimension_numbers<[1], [0], [0], [1], [0, 0, 1, 1], [], []>} : vector<256x256xbf16>, vector<256x128xbf16>, vector<256x128xf32> -> vector<256x128xf32>
    %10 = vector.broadcast %1 : vector<256x1xf32> to vector<256x128xf32>
    %11 = arith.mulf %9, %10 : vector<256x128xf32>
    %12 = vector.broadcast %4 : vector<1x128xf32> to vector<256x128xf32>
    %13 = arith.addf %11, %12 : vector<256x128xf32>
    %cst_10 = arith.constant 0.000000e+00 : f32
    %14 = vector.broadcast %cst_10 : f32 to vector<256x128xf32>
    %15 = arith.maximumf %13, %14 : vector<256x128xf32>
    %16 = arith.truncf %15 : vector<256x128xf32> to vector<256x128xbf16>
    %c0_11 = arith.constant 0 : index
    %c0_12 = arith.constant 0 : index
    %17 = vector.load %arg6[%c0_11, %c0_12] : memref<128x128xbf16, #tpu.memory_space<vmem>>, vector<128x128xbf16>
    %c0_13 = arith.constant 0 : index
    %c0_14 = arith.constant 0 : index
    %18 = vector.load %arg7[%c0_13, %c0_14] : memref<1x128xf32, #tpu.memory_space<vmem>>, vector<1x128xf32>
    %cst_15 = arith.constant dense<0.000000e+00> : vector<256x128xf32>
    %19 = tpu.matmul %16, %17, %cst_15 {dimension_numbers = #tpu.dot_dimension_numbers<[1], [0], [0], [1], [0, 0, 1, 1], [], []>} : vector<256x128xbf16>, vector<128x128xbf16>, vector<256x128xf32> -> vector<256x128xf32>
    %20 = vector.broadcast %1 : vector<256x1xf32> to vector<256x128xf32>
    %21 = arith.mulf %19, %20 : vector<256x128xf32>
    %22 = arith.truncf %21 : vector<256x128xf32> to vector<256x128xbf16>
    %cst_16 = arith.constant dense<0.000000e+00> : vector<256x128xf32>
    %23 = tpu.matmul %0, %22, %cst_16 {dimension_numbers = #tpu.dot_dimension_numbers<[1], [0], [0], [1], [0, 0, 1, 1], [], []>} : vector<256x256xbf16>, vector<256x128xbf16>, vector<256x128xf32> -> vector<256x128xf32>
    %24 = vector.broadcast %1 : vector<256x1xf32> to vector<256x128xf32>
    %25 = arith.mulf %23, %24 : vector<256x128xf32>
    %26 = vector.broadcast %18 : vector<1x128xf32> to vector<256x128xf32>
    %27 = arith.addf %25, %26 : vector<256x128xf32>
    %cst_17 = arith.constant 0.000000e+00 : f32
    %28 = vector.broadcast %cst_17 : f32 to vector<256x128xf32>
    %29 = arith.maximumf %27, %28 : vector<256x128xf32>
    %30 = arith.truncf %29 : vector<256x128xf32> to vector<256x128xbf16>
    %c0_18 = arith.constant 0 : index
    %c0_19 = arith.constant 0 : index
    %31 = vector.load %arg8[%c0_18, %c0_19] : memref<128x128xbf16, #tpu.memory_space<vmem>>, vector<128x128xbf16>
    %c0_20 = arith.constant 0 : index
    %c0_21 = arith.constant 0 : index
    %32 = vector.load %arg9[%c0_20, %c0_21] : memref<1x128xf32, #tpu.memory_space<vmem>>, vector<1x128xf32>
    %cst_22 = arith.constant dense<0.000000e+00> : vector<256x128xf32>
    %33 = tpu.matmul %30, %31, %cst_22 {dimension_numbers = #tpu.dot_dimension_numbers<[1], [0], [0], [1], [0, 0, 1, 1], [], []>} : vector<256x128xbf16>, vector<128x128xbf16>, vector<256x128xf32> -> vector<256x128xf32>
    %34 = vector.broadcast %1 : vector<256x1xf32> to vector<256x128xf32>
    %35 = arith.mulf %33, %34 : vector<256x128xf32>
    %36 = arith.truncf %35 : vector<256x128xf32> to vector<256x128xbf16>
    %cst_23 = arith.constant dense<0.000000e+00> : vector<256x128xf32>
    %37 = tpu.matmul %0, %36, %cst_23 {dimension_numbers = #tpu.dot_dimension_numbers<[1], [0], [0], [1], [0, 0, 1, 1], [], []>} : vector<256x256xbf16>, vector<256x128xbf16>, vector<256x128xf32> -> vector<256x128xf32>
    %38 = vector.broadcast %1 : vector<256x1xf32> to vector<256x128xf32>
    %39 = arith.mulf %37, %38 : vector<256x128xf32>
    %40 = vector.broadcast %32 : vector<1x128xf32> to vector<256x128xf32>
    %41 = arith.addf %39, %40 : vector<256x128xf32>
    %c0_24 = arith.constant 0 : index
    %c0_25 = arith.constant 0 : index
    %42 = vector.load %arg10[%c0_24, %c0_25] : memref<256x128xf32, #tpu.memory_space<vmem>>, vector<256x128xf32>
    tpu.vector_store %arg10[%c0_24, %c0_25], %41 {strides = array<i32>} : memref<256x128xf32, #tpu.memory_space<vmem>>, vector<256x128xf32>,
    %c0_26 = arith.constant 0 : index
    %c0_27 = arith.constant 0 : index
    %43 = vector.load %arg11[%c0_26, %c0_27] : memref<256x128xf32, #tpu.memory_space<vmem>>, vector<256x128xf32>
    tpu.vector_store %arg11[%c0_26, %c0_27], %29 {strides = array<i32>} : memref<256x128xf32, #tpu.memory_space<vmem>>, vector<256x128xf32>,
    return
  }
  func.func @transform_0(%arg0: i32) -> (i32, i32) {
    %c0_i32 = arith.constant 0 : i32
    %c0_i32_0 = arith.constant 0 : i32
    %c0_i32_1 = arith.constant 0 : i32
    return %c0_i32, %c0_i32_0 : i32, i32
  }
  func.func @transform_1(%arg0: i32) -> (i32, i32) {
    %c0_i32 = arith.constant 0 : i32
    %c0_i32_0 = arith.constant 0 : i32
    %c0_i32_1 = arith.constant 0 : i32
    return %c0_i32, %c0_i32_0 : i32, i32
  }
  func.func @transform_2(%arg0: i32) -> (i32, i32) {
    %c0_i32 = arith.constant 0 : i32
    %c0_i32_0 = arith.constant 0 : i32
    %c0_i32_1 = arith.constant 0 : i32
    return %c0_i32, %c0_i32_0 : i32, i32
  }
  func.func @transform_3(%arg0: i32) -> (i32, i32) {
    %c0_i32 = arith.constant 0 : i32
    %c0_i32_0 = arith.constant 0 : i32
    %c0_i32_1 = arith.constant 0 : i32
    return %c0_i32, %c0_i32_0 : i32, i32
  }
  func.func @transform_4(%arg0: i32) -> (i32, i32) {
    %c0_i32 = arith.constant 0 : i32
    %c0_i32_0 = arith.constant 0 : i32
    %c0_i32_1 = arith.constant 0 : i32
    return %c0_i32, %c0_i32_0 : i32, i32
  }
  func.func @transform_5(%arg0: i32) -> (i32, i32) {
    %c0_i32 = arith.constant 0 : i32
    %c0_i32_0 = arith.constant 0 : i32
    %c0_i32_1 = arith.constant 0 : i32
    return %c0_i32, %c0_i32_0 : i32, i32
  }
  func.func @transform_6(%arg0: i32) -> (i32, i32) {
    %c0_i32 = arith.constant 0 : i32
    %c0_i32_0 = arith.constant 0 : i32
    %c0_i32_1 = arith.constant 0 : i32
    return %c0_i32, %c0_i32_0 : i32, i32
  }
  func.func @transform_7(%arg0: i32) -> (i32, i32) {
    %c0_i32 = arith.constant 0 : i32
    %c0_i32_0 = arith.constant 0 : i32
    %c0_i32_1 = arith.constant 0 : i32
    return %c0_i32, %c0_i32_0 : i32, i32
  }
  func.func @transform_8(%arg0: i32) -> (i32, i32) {
    %c0_i32 = arith.constant 0 : i32
    %c0_i32_0 = arith.constant 0 : i32
    %c0_i32_1 = arith.constant 0 : i32
    return %c0_i32, %c0_i32_0 : i32, i32
  }
  func.func @transform_9(%arg0: i32) -> (i32, i32) {
    %c0_i32 = arith.constant 0 : i32
    %c0_i32_0 = arith.constant 0 : i32
    %c0_i32_1 = arith.constant 0 : i32
    return %c0_i32, %c0_i32_0 : i32, i32
  }
  func.func @transform_10(%arg0: i32) -> (i32, i32) {
    %c0_i32 = arith.constant 0 : i32
    %c0_i32_0 = arith.constant 0 : i32
    %c0_i32_1 = arith.constant 0 : i32
    return %c0_i32, %c0_i32_0 : i32, i32
  }
}

</mosaic_0001>

<bundles_post_ra>
// kernel: tpu_custom_call.1
= control target key start
LH: loop header
LB: loop body
LE: loop exit
PB: predicated region body
PF: predicated region fallthrough
CT: control target
= control target key end

     0   :  { %16 = vsyncpa [#allocation3], 0  ;;  %s4209_s0 = inlined_call_operand.vmem [shape: bf16[256,256], index: 0, kind: input, shape index: {}]   ;;  %s4210_s1 = inlined_call_operand.vmem [shape: f32[256,1], index: 1, kind: input, shape index: {}]   ;;  %s4211_s2 = inlined_call_operand.hbm [shape: bf16[256,128], index: 2, kind: input, shape index: {}]   ;;  %s4212_s3 = inlined_call_operand.hbm [shape: bf16[128,128], index: 3, kind: input, shape index: {}]   ;;  %s4213_s4 = inlined_call_operand.vmem [shape: f32[1,128], index: 4, kind: input, shape index: {}]   ;;  %s4214_s5 = inlined_call_operand.hbm [shape: bf16[128,128], index: 5, kind: input, shape index: {}]   ;;  %s4215_s6 = inlined_call_operand.vmem [shape: f32[1,128], index: 6, kind: input, shape index: {}]   ;;  %s4216_s7 = inlined_call_operand.hbm [shape: bf16[128,128], index: 7, kind: input, shape index: {}]   ;;  %s4217_s8 = inlined_call_operand.vmem [shape: f32[1,128], index: 8, kind: input, shape index: {}]   ;;  %s4218_s9 = inlined_call_operand.hbm [shape: f32[256,128], index: 9, kind: output, shape index: {0}]   ;;  %s4219_s10 = inlined_call_operand.hbm [shape: f32[256,128], index: 10, kind: output, shape index: {1}]  }
   0x1   :  { %17 = vsyncpa [#allocation6], 0 }
   0x2   :  { %18 = vsyncpa [#allocation9], 0 }
   0x3   :  { %19 = vsyncpa [#allocation4], 0 }
   0x4   :  { %20 = vsyncpa [#allocation12], 0  ;;  %s3220_s13 = smov [#allocation5]   ;;  %s3221_s15 = smov [#allocation2]  }
   0x5   :  { %s42_s14 = sshll.u32 %s3220_s13, 4  ;;  %s30_s16 = sshll.u32 %s3221_s15, 4  ;;  %s43_s14 = int_to_ptr.vmem [resolvable:$true] %s42_s14  ;;  %s31_s16 = int_to_ptr.vmem [resolvable:$true] %s30_s16 }
   0x6   :  { %s3098_s17 = scalar_lea.vmem %s43_s14, 1024  ;;  %p3103_p1 = scmp.lt.s32.totalorder %s43_s14, %s43_s14 }
   0x7   :  { %p3099_p0 = scmp.ne.s32.totalorder %s43_s14, %s3098_s17  ;;  %p3104_p2 = scmp.lt.s32.totalorder %s3098_s17, %s3098_s17 }
   0x9   :  { %p3105_p3 = por %p3104_p2, %p3103_p1 }
   0xb   :  { %p3106_p4 = pnand %p3105_p3, %p3099_p0 }
   0xd   :  { %3109 = shalt.err (!%p3106_p4)
}
   0xe   :  { %s3222_s18 = smov 64   ;;  %s3223_s19 = smov 4  }
   0xf   :  { %48 = dma.hbm_to_vmem [thread:$0]  %s4212_s3, 1024, %s43_s14, [#allocation6], %s3222_s18, %s3222_s18, %s3223_s19  }
  0x10   :  { %s3118_s22 = scalar_lea.vmem %s31_s16, 2048  ;;  %p3123_p6 = scmp.lt.s32.totalorder %s31_s16, %s31_s16 }
  0x11   :  { %p3119_p5 = scmp.ne.s32.totalorder %s31_s16, %s3118_s22  ;;  %p3124_p7 = scmp.lt.s32.totalorder %s3118_s22, %s3118_s22 }
  0x13   :  { %p3125_p8 = por %p3124_p7, %p3123_p6 }
  0x15   :  { %p3126_p9 = pnand %p3125_p8, %p3119_p5 }
  0x17   :  { %3129 = shalt.err (!%p3126_p9)
}
  0x18   :  { %36 = dma.hbm_to_vmem [thread:$0]  %s4211_s2, 2048, %s31_s16, [#allocation3], %s3222_s18, %s3222_s18, %s3223_s19  }
  0x19   :  { %s3224_s25 = smov [#allocation7]   ;;  %s3225_s27 = smov [#allocation8]  }
  0x1a   :  { %s56_s26 = sshll.u32 %s3224_s25, 4  ;;  %s70_s28 = sshll.u32 %s3225_s27, 4  ;;  %s57_s26 = int_to_ptr.vmem [resolvable:$true] %s56_s26  ;;  %s71_s28 = int_to_ptr.vmem [resolvable:$true] %s70_s28 }
  0x1b   :  { %s3138_s3 = scalar_lea.vmem %s57_s26, 1024  ;;  %p3143_p11 = scmp.lt.s32.totalorder %s57_s26, %s57_s26 }
  0x1c   :  { %p3139_p10 = scmp.ne.s32.totalorder %s57_s26, %s3138_s3  ;;  %p3144_p12 = scmp.lt.s32.totalorder %s3138_s3, %s3138_s3 }
  0x1e   :  { %p3145_p13 = por %p3144_p12, %p3143_p11 }
  0x20   :  { %p3146_p0 = pnand %p3145_p13, %p3139_p10 }
  0x22   :  { %3149 = shalt.err (!%p3146_p0)
}
  0x23   :  { %62 = dma.hbm_to_vmem [thread:$0]  %s4214_s5, 1024, %s57_s26, [#allocation6], %s3222_s18, %s3222_s18, %s3223_s19  }
  0x24   :  { %s3158_s2 = scalar_lea.vmem %s71_s28, 1024  ;;  %p3163_p2 = scmp.lt.s32.totalorder %s71_s28, %s71_s28 }
  0x25   :  { %p3159_p1 = scmp.ne.s32.totalorder %s71_s28, %s3158_s2  ;;  %p3164_p3 = scmp.lt.s32.totalorder %s3158_s2, %s3158_s2 }
  0x27   :  { %p3165_p4 = por %p3164_p3, %p3163_p2 }
  0x29   :  { %p3166_p5 = pnand %p3165_p4, %p3159_p1 }
  0x2b   :  { %3169 = shalt.err (!%p3166_p5)
}
  0x2c   :  { %76 = dma.hbm_to_vmem [thread:$0]  %s4216_s7, 1024, %s71_s28, [#allocation9], %s3222_s18, %s3222_s18, %s3223_s19  }
  0x2d   :  { %3210 = dma.done.wait [#allocation3], 2048  }
  0x2e   :  { %3211 = vsyncadd [#allocation3], 4294965248 }
  0x2f   :  { %3212 = dma.done.wait [#allocation6], 2048  }
  0x30   :  { %3213 = vsyncadd [#allocation6], 4294965248 }
  0x31   :  { %3214 = dma.done.wait [#allocation9], 1024  }
  0x32   :  { %3215 = vsyncadd [#allocation9], 4294966272  ;;  %v3226_v0 = vmov 0   ;;  %v2970_v1 = vld [vmem:[#allocation5 + $0x38] sm:$0xff]   ;;  %v2971_v2 = vld [vmem:[#allocation5 + $0x30] sm:$0xff]   ;;  %s3227_s3 = smov [#allocation11]  }
  0x33   :  { %2968 = vset.pattern.permute.xlu0 %v3226_v0  ;;  %2969 = vset.pattern.permute.xlu1 %v3226_v0  ;;  %v2972_v3 = vld [vmem:[#allocation5 + $0x28] sm:$0xff]   ;;  %v2973_v4 = vld [vmem:[#allocation5 + $0x20] sm:$0xff]   ;;  %v2974_v6 = vld [vmem:[#allocation5 + $0x18] sm:$0xff]   ;;  %s2296_s29 = sshll.u32 %s3227_s3, 4  ;;  %s2297_s29 = int_to_ptr.vmem [resolvable:$true] %s2296_s29 }
  0x34   :  { %2797 = vmatprep.subr.bf16.mxu0 %v2970_v1  ;;  %v2978_v5 = vld [vmem:[#allocation2] sm:$0xff]   ;;  %v154_v7 = vld [vmem:[%s4210_s1 + $0xf0] sm:$0xff]  ;;  %v155_v9 = vld [vmem:[%s4210_s1 + $0xf8] sm:$0xff]  ;;  %p3175_p7 = scmp.lt.s32.totalorder %s2297_s29, %s2297_s29 }
  0x35   :  { %2798 = vmatpush3.bf16.msra.mxu0 %v2970_v1  ;;  %2813 = vmatprep.mubr.bf16.mxu0 %v2978_v5  ;;  %v138_v8 = vld [vmem:[%s4210_s1 + $0x70] sm:$0xff]  ;;  %v139_v10 = vld [vmem:[%s4210_s1 + $0x78] sm:$0xff]  ;;  %v152_v12 = vld [vmem:[%s4210_s1 + $0xe0] sm:$0xff] }
  0x36   :  { %2799 = vmatprep.subr.bf16.mxu0 %v2971_v2  ;;  %662 = vperm.xlu0 %2968, %v154_v7   ;;  %v2975_v11 = vld [vmem:[#allocation5 + $0x10] sm:$0xff]   ;;  %v153_v13 = vld [vmem:[%s4210_s1 + $0xe8] sm:$0xff]  ;;  %v136_v15 = vld [vmem:[%s4210_s1 + $0x60] sm:$0xff] }
  0x37   :  { %582 = vperm.xlu1 %2969, %v138_v8   ;;  %v2976_v14 = vld [vmem:[#allocation5 + $0x8] sm:$0xff]   ;;  %v2977_v17 = vld [vmem:[#allocation5] sm:$0xff]   ;;  %v150_v18 = vld [vmem:[%s4210_s1 + $0xd0] sm:$0xff] }
  0x38   :  { %v137_v16 = vld [vmem:[%s4210_s1 + $0x68] sm:$0xff]  ;;  %v151_v19 = vld [vmem:[%s4210_s1 + $0xd8] sm:$0xff]  ;;  %v134_v21 = vld [vmem:[%s4210_s1 + $0x50] sm:$0xff] }
  0x39   :  { %2800 = vmatpush3.bf16.msra.mxu0 %v2971_v2  ;;  %v2979_v20 = vld [vmem:[#allocation2 + $0x8] sm:$0xff]   ;;  %v2980_v22 = vld [vmem:[#allocation2 + $0x10] sm:$0xff]   ;;  %v135_v23 = vld [vmem:[%s4210_s1 + $0x58] sm:$0xff] }
  0x3a   :  { %2801 = vmatprep.subr.bf16.mxu0 %v2972_v3  ;;  %667 = vperm.xlu0 %2968, %v155_v9   ;;  %v148_v24 = vld [vmem:[%s4210_s1 + $0xc0] sm:$0xff]  ;;  %v149_v25 = vld [vmem:[%s4210_s1 + $0xc8] sm:$0xff]  ;;  %v2981_v26 = vld [vmem:[#allocation2 + $0x18] sm:$0xff]  }
  0x3b   :  { %587 = vperm.xlu1 %2969, %v139_v10   ;;  %v132_v27 = vld [vmem:[%s4210_s1 + $0x40] sm:$0xff]  ;;  %v133_v29 = vld [vmem:[%s4210_s1 + $0x48] sm:$0xff]  ;;  %v146_v30 = vld [vmem:[%s4210_s1 + $0xb0] sm:$0xff] }
  0x3c   :  { %v2982_v28 = vld [vmem:[#allocation2 + $0x20] sm:$0xff]   ;;  %v147_v31 = vld [vmem:[%s4210_s1 + $0xb8] sm:$0xff]  ;;  %v2983_v32 = vld [vmem:[#allocation2 + $0x28] sm:$0xff]  }
  0x3d   :  { %2802 = vmatpush3.bf16.msra.mxu0 %v2972_v3  ;;  %v130_v33 = vld [vmem:[%s4210_s1 + $0x30] sm:$0xff]  ;;  %v131_v35 = vld [vmem:[%s4210_s1 + $0x38] sm:$0xff]  ;;  %v144_v36 = vld [vmem:[%s4210_s1 + $0xa0] sm:$0xff] }
  0x3e   :  { %2803 = vmatprep.subr.bf16.mxu0 %v2973_v4  ;;  %652 = vperm.xlu0 %2968, %v152_v12   ;;  %v2984_v34 = vld [vmem:[#allocation2 + $0x30] sm:$0xff]   ;;  %v145_v37 = vld [vmem:[%s4210_s1 + $0xa8] sm:$0xff]  ;;  %v2985_v38 = vld [vmem:[#allocation2 + $0x38] sm:$0xff]  }
  0x3f   :  { %657 = vperm.xlu1 %2969, %v153_v13   ;;  %v128_v39 = vld [vmem:[%s4210_s1 + $0x20] sm:$0xff]  ;;  %v129_v41 = vld [vmem:[%s4210_s1 + $0x28] sm:$0xff]  ;;  %v142_v42 = vld [vmem:[%s4210_s1 + $0x90] sm:$0xff] }
  0x40   :  { %v2986_v40 = vld [vmem:[#allocation2 + $0x40] sm:$0xff]   ;;  %v143_v43 = vld [vmem:[%s4210_s1 + $0x98] sm:$0xff]  ;;  %v2987_v44 = vld [vmem:[#allocation2 + $0x48] sm:$0xff]  }
  0x41   :  { %2804 = vmatpush3.bf16.msra.mxu0 %v2973_v4  ;;  %v126_v45 = vld [vmem:[%s4210_s1 + $0x10] sm:$0xff]  ;;  %v127_v47 = vld [vmem:[%s4210_s1 + $0x18] sm:$0xff]  ;;  %v140_v48 = vld [vmem:[%s4210_s1 + $0x80] sm:$0xff] }
  0x42   :  { %2805 = vmatprep.subr.bf16.mxu0 %v2974_v6  ;;  %572 = vperm.xlu0 %2968, %v136_v15   ;;  %v2988_v46 = vld [vmem:[#allocation2 + $0x50] sm:$0xff]   ;;  %v141_v49 = vld [vmem:[%s4210_s1 + $0x88] sm:$0xff]  ;;  %v2989_v50 = vld [vmem:[#allocation2 + $0x58] sm:$0xff]  }
  0x43   :  { %577 = vperm.xlu1 %2969, %v137_v16   ;;  %v124_v51 = vld [vmem:[%s4210_s1] sm:$0xff]  ;;  %v125_v53 = vld [vmem:[%s4210_s1 + $0x8] sm:$0xff]  ;;  %v2992_v55 = vld [vmem:[#allocation2 + $0x70] sm:$0xff]  }
  0x44   :  { %v2990_v52 = vld [vmem:[#allocation2 + $0x60] sm:$0xff]   ;;  %v2991_v54 = vld [vmem:[#allocation2 + $0x68] sm:$0xff]   ;;  %v2993_v56 = vld [vmem:[#allocation2 + $0x78] sm:$0xff]  }
  0x45   :  { %2806 = vmatpush3.bf16.msra.mxu0 %v2974_v6  ;;  %v3437_v7 = vld [vmem:[%s4209_s0 + $0x4] ss:$8 sps:$4 sm:$0xff]  }
  0x46   :  { %2807 = vmatprep.subr.bf16.mxu0 %v2975_v11  ;;  %642 = vperm.xlu0 %2968, %v150_v18   ;;  %4288 = vst [vmem:[#allocation18_spill] sm:$0xff] %v3437_v7  ;;  %v2997_v8 = vld [vmem:[%s4209_s0 + $0x44] ss:$8 sps:$4 sm:$0xff]  }
  0x47   :  { %647 = vperm.xlu1 %2969, %v151_v19   ;;  %942 = vmatprep.mubr.bf16.mxu1 %v2997_v8 }
  0x49   :  { %2808 = vmatpush3.bf16.msra.mxu0 %v2975_v11 }
  0x4a   :  { %2809 = vmatprep.subr.bf16.mxu0 %v2976_v14  ;;  %562 = vperm.xlu0 %2968, %v134_v21  }
  0x4b   :  { %567 = vperm.xlu1 %2969, %v135_v23  }
  0x4d   :  { %2810 = vmatpush3.bf16.msra.mxu0 %v2976_v14 }
  0x4e   :  { %2811 = vmatprep.subr.bf16.mxu0 %v2977_v17  ;;  %632 = vperm.xlu0 %2968, %v148_v24  }
  0x4f   :  { %637 = vperm.xlu1 %2969, %v149_v25  }
  0x51   :  { %2812 = vmatpush3.bf16.msra.mxu0 %v2977_v17 }
  0x52   :  { %552 = vperm.xlu0 %2968, %v132_v27  }
  0x53   :  { %557 = vperm.xlu1 %2969, %v133_v29  }
  0x54   :  { %2814 = vmatmul.mubr.bf16.vlgmr.msra.gmra.mxu0 %v2979_v20 }
  0x55   :  { %2817 = vmatprep.mubr.bf16.mxu0 %v2980_v22 }
  0x56   :  { %622 = vperm.xlu0 %2968, %v146_v30  }
  0x57   :  { %627 = vperm.xlu1 %2969, %v147_v31  }
  0x5a   :  { %542 = vperm.xlu0 %2968, %v130_v33  }
  0x5b   :  { %547 = vperm.xlu1 %2969, %v131_v35  }
  0x5c   :  { %2818 = vmatmul.mubr.bf16.gmra.mxu0 %v2981_v26 }
  0x5d   :  { %2821 = vmatprep.mubr.bf16.mxu0 %v2982_v28 }
  0x5e   :  { %612 = vperm.xlu0 %2968, %v144_v36  }
  0x5f   :  { %617 = vperm.xlu1 %2969, %v145_v37  }
  0x62   :  { %532 = vperm.xlu0 %2968, %v128_v39  }
  0x63   :  { %537 = vperm.xlu1 %2969, %v129_v41  }
  0x64   :  { %2822 = vmatmul.mubr.bf16.gmra.mxu0 %v2983_v32 }
  0x65   :  { %2825 = vmatprep.mubr.bf16.mxu0 %v2984_v34 }
  0x66   :  { %602 = vperm.xlu0 %2968, %v142_v42  }
  0x67   :  { %607 = vperm.xlu1 %2969, %v143_v43  }
  0x6a   :  { %522 = vperm.xlu0 %2968, %v126_v45  }
  0x6b   :  { %527 = vperm.xlu1 %2969, %v127_v47  }
  0x6c   :  { %2826 = vmatmul.mubr.bf16.gmra.mxu0 %v2985_v38 }
  0x6d   :  { %2829 = vmatprep.mubr.bf16.mxu0 %v2986_v40 }
  0x6e   :  { %592 = vperm.xlu0 %2968, %v140_v48  }
  0x6f   :  { %597 = vperm.xlu1 %2969, %v141_v49  }
  0x72   :  { %512 = vperm.xlu0 %2968, %v124_v51  }
  0x73   :  { %517 = vperm.xlu1 %2969, %v125_v53  }
  0x74   :  { %2830 = vmatmul.mubr.bf16.gmra.mxu0 %v2987_v44 }
  0x75   :  { %2833 = vmatprep.mubr.bf16.mxu0 %v2988_v46 }
  0x7c   :  { %2834 = vmatmul.mubr.bf16.gmra.mxu0 %v2989_v50 }
  0x7d   :  { %2837 = vmatprep.mubr.bf16.mxu0 %v2990_v52 }
  0x84   :  { %2838 = vmatmul.mubr.bf16.gmra.mxu0 %v2991_v54 }
  0x85   :  { %2841 = vmatprep.mubr.bf16.mxu0 %v2992_v55 }
  0x8c   :  { %2842 = vmatmul.mubr.bf16.gmra.mxu0 %v2993_v56 }
  0x8d   :  { %910 = vmatprep.mubr.bf16.mxu0 %v3437_v7 }
  0xb1   :  { %v3406_v57 = vpop.permute.xlu0 %662 }
  0xb2   :  { %v3408_v58 = vpop.permute.xlu1 %582 }
  0xb5   :  { %v3410_v59 = vpop.permute.xlu0 %667 }
  0xb6   :  { %v3412_v60 = vpop.permute.xlu1 %587 }
  0xb9   :  { %v3414_v61 = vpop.permute.xlu0 %652 }
  0xba   :  { %v3416_v62 = vpop.permute.xlu1 %657 }
  0xbd   :  { %v3418_v63 = vpop.permute.xlu0 %572 }
  0xbe   :  { %v3420_v0 = vpop.permute.xlu1 %577 }
  0xc1   :  { %v3422_v1 = vpop.permute.xlu0 %642 }
  0xc2   :  { %v3424_v2 = vpop.permute.xlu1 %647 }
  0xc5   :  { %v3426_v3 = vpop.permute.xlu0 %562 }
  0xc6   :  { %v3428_v4 = vpop.permute.xlu1 %567 }
  0xc9   :  { %v3430_v5 = vpop.permute.xlu0 %632 }
  0xca   :  { %v3432_v6 = vpop.permute.xlu1 %637 }
  0xcd   :  { %v3442_v9 = vpop.permute.xlu0 %552 }
  0xce   :  { %v3444_v10 = vpop.permute.xlu1 %557 }
  0xcf   :  { %4289 = vst [vmem:[#allocation19_spill] sm:$0xff] %v3444_v10 }
  0xd1   :  { %v3447_v11 = vpop.permute.xlu0 %622 }
  0xd2   :  { %v3449_v12 = vpop.permute.xlu1 %627 }
  0xd5   :  { %v3451_v13 = vpop.permute.xlu0 %542 }
  0xd6   :  { %4290 = vst [vmem:[#allocation20_spill] sm:$0xff] %v3451_v13  ;;  %v3453_v14 = vpop.permute.xlu1 %547 }
  0xd7   :  { %4291 = vst [vmem:[#allocation21_spill] sm:$0xff] %v3453_v14 }
  0xd9   :  { %v3455_v15 = vpop.permute.xlu0 %612 }
  0xda   :  { %v3457_v16 = vpop.permute.xlu1 %617 }
  0xdd   :  { %v3459_v17 = vpop.permute.xlu0 %532 }
  0xde   :  { %4292 = vst [vmem:[#allocation22_spill] sm:$0xff] %v3459_v17  ;;  %v3461_v18 = vpop.permute.xlu1 %537 }
  0xdf   :  { %4293 = vst [vmem:[#allocation23_spill] sm:$0xff] %v3461_v18 }
  0xe1   :  { %v3463_v19 = vpop.permute.xlu0 %602 }
  0xe2   :  { %v3465_v20 = vpop.permute.xlu1 %607 }
  0xe5   :  { %v3469_v23 = vpop.permute.xlu0 %522 }
  0xe6   :  { %4294 = vst [vmem:[#allocation24_spill] sm:$0xff] %v3469_v23  ;;  %v3471_v24 = vpop.permute.xlu1 %527 }
  0xe7   :  { %4295 = vst [vmem:[#allocation25_spill] sm:$0xff] %v3471_v24 }
 0x114   :  { %v2815_v21 = vpop.f32.mrf.mxu0 }
 0x115   :  { %v672_v26 = vmul.f32 %v2815_v21, %v3469_v23 }
 0x116   :  { %v3467_v22 = vpop.f32.mrf.mxu0 }
 0x118   :  { %v2816_v25 = vpop.f32.mrf.mxu0 }
 0x119   :  { %v673_v27 = vmul.f32 %v2816_v25, %v3471_v24 }
 0x11a   :  { %v3475_v28 = vpop.f32.mrf.mxu0 }
 0x11b   :  { %v3477_v29 = vpack.c.bf16 %v673_v27, %v672_v26 }
 0x11c   :  { %v2819_v30 = vpop.f32.mrf.mxu0 }
 0x11d   :  { %4296 = vst [vmem:[#allocation26_spill] sm:$0xff] %v3477_v29  ;;  %v676_v33 = vmul.f32 %v2819_v30, %v3451_v13 }
 0x11e   :  { %v3479_v31 = vpop.f32.mrf.mxu0 }
 0x120   :  { %v2820_v32 = vpop.f32.mrf.mxu0 }
 0x121   :  { %v677_v34 = vmul.f32 %v2820_v32, %v3453_v14 }
 0x122   :  { %v3483_v35 = vpop.f32.mrf.mxu0 }
 0x123   :  { %v3485_v36 = vpack.c.bf16 %v677_v34, %v676_v33 }
 0x124   :  { %v2823_v37 = vpop.f32.mrf.mxu0 }
 0x126   :  { %v415_v38 = vpop.f32.mrf.mxu0 }
 0x128   :  { %v2824_v39 = vpop.f32.mrf.mxu0 }
 0x12a   :  { %v418_v40 = vpop.f32.mrf.mxu0 }
 0x12c   :  { %v2827_v41 = vpop.f32.mrf.mxu0 }
 0x12d   :  { %v684_v32 = vmul.f32 %v2827_v41, %v3408_v58 }
 0x12e   :  { %v431_v42 = vpop.f32.mrf.mxu0 }
 0x130   :  { %v2828_v43 = vpop.f32.mrf.mxu0 }
 0x131   :  { %v685_v25 = vmul.f32 %v2828_v43, %v3412_v60  ;;  %v682_v43 = vmul.f32 %v3418_v63, %v431_v42 }
 0x132   :  { %v434_v44 = vpop.f32.mrf.mxu0 }
 0x133   :  { %v709_v13 = vpack.c.bf16 %v685_v25, %v684_v32  ;;  %v683_v24 = vmul.f32 %v3420_v0, %v434_v44  ;;  %v680_v44 = vmul.f32 %v2823_v37, %v3426_v3 }
 0x134   :  { %v3487_v45 = vpop.f32.mrf.mxu0 }
 0x136   :  { %v3489_v46 = vpop.f32.mrf.mxu0 }
 0x138   :  { %v3491_v47 = vpop.f32.mrf.mxu0 }
 0x13a   :  { %v3493_v48 = vpop.f32.mrf.mxu0 }
 0x13c   :  { %v2835_v49 = vpop.f32.mrf.mxu0 }
 0x13e   :  { %v463_v50 = vpop.f32.mrf.mxu0 }
 0x140   :  { %v2836_v51 = vpop.f32.mrf.mxu0 }
 0x141   :  { %v693_v42 = vmul.f32 %v2836_v51, %v3449_v12  ;;  %v3519_v51 = vpop.permute.xlu0 %592 }
 0x142   :  { %v466_v52 = vpop.f32.mrf.mxu0 }
 0x144   :  { %v2839_v53 = vpop.f32.mrf.mxu0 }
 0x145   :  { %v696_v41 = vmul.f32 %v2839_v53, %v3422_v1  ;;  %v691_v53 = vmul.f32 %v3457_v16, %v466_v52  ;;  %v674_v52 = vmul.f32 %v3459_v17, %v3479_v31  ;;  %v686_v31 = vmul.f32 %v3519_v51, %v3489_v46  ;;  %v3546_v46 = vld [vmem:[%s4209_s0] ss:$8 sps:$4 sm:$0xff]  }
 0x146   :  { %v479_v54 = vpop.f32.mrf.mxu0 }
 0x148   :  { %v2840_v55 = vpop.f32.mrf.mxu0 }
 0x149   :  { %v697_v23 = vmul.f32 %v2840_v55, %v3424_v2 }
 0x14a   :  { %v482_v56 = vpop.f32.mrf.mxu0 }
 0x14b   :  { %v695_v25 = vmul.f32 %v3432_v6, %v482_v56 }
 0x14c   :  { %v2843_v8 = vpop.f32.mrf.mxu0 }
 0x14d   :  { %v700_v27 = vmul.f32 %v2843_v8, %v3406_v57  ;;  %v681_v8 = vmul.f32 %v2824_v39, %v3428_v4  ;;  %v678_v39 = vmul.f32 %v3442_v9, %v415_v38  ;;  %v675_v38 = vmul.f32 %v3461_v18, %v3483_v35 }
 0x14e   :  { %v495_v21 = vpop.f32.mrf.mxu0 }
 0x14f   :  { %v698_v34 = vmul.f32 %v3414_v61, %v495_v21  ;;  %v708_v21 = vpack.c.bf16 %v683_v24, %v682_v43  ;;  %v704_v56 = vpack.c.bf16 %v675_v38, %v674_v52  ;;  %v3561_v43 = vld [vmem:[%s4209_s0 + $0x54] ss:$8 sps:$4 sm:$0xff]   ;;  %v3684_v52 = vld [vmem:[%s4209_s0 + $0xc0] ss:$8 sps:$4 sm:$0xff]  }
 0x150   :  { %v2844_v26 = vpop.f32.mrf.mxu0  ;;  %4303 = vst [vmem:[#allocation31_spill] sm:$0xff] %v3561_v43  ;;  %v3665_v38 = vld [vmem:[%s4209_s0 + $0xb4] ss:$8 sps:$4 sm:$0xff]   ;;  %4323 = vst [vmem:[#allocation51_spill] sm:$0xff] %v3684_v52 }
 0x151   :  { %v701_v30 = vmul.f32 %v2844_v26, %v3410_v59  ;;  %v715_v26 = vpack.c.bf16 %v697_v23, %v696_v41  ;;  %v692_v23 = vmul.f32 %v2835_v49, %v3447_v11  ;;  %v689_v49 = vmul.f32 %v3491_v47, %v3465_v20  ;;  %v3043_v41 = vld [vmem:[#allocation7 + $0x30] sm:$0xff]   ;;  %4320 = vst [vmem:[#allocation48_spill] sm:$0xff] %v3665_v38 }
 0x152   :  { %v498_v33 = vpop.f32.mrf.mxu0 }
 0x153   :  { %v717_v7 = vpack.c.bf16 %v701_v30, %v700_v27  ;;  %v699_v14 = vmul.f32 %v3416_v62, %v498_v33  ;;  %v713_v37 = vpack.c.bf16 %v693_v42, %v692_v23  ;;  %v3533_v30 = vpop.permute.xlu0 %512  ;;  %v4299_v33 = vld [vmem:[#allocation26_spill] sm:$0xff]  ;;  %v3618_v42 = vld [vmem:[%s4209_s0 + $0x30] ss:$8 sps:$4 sm:$0xff]  }
 0x154   :  { %4298 = vst [vmem:[#allocation28_spill] sm:$0xff] %v3533_v30  ;;  %v670_v32 = vmul.f32 %v3533_v30, %v3467_v22  ;;  %4300 = vst [vmem:[#allocation26_spill] sm:$0xff] %v3546_v46  ;;  %v3556_v22 = vld [vmem:[%s4209_s0 + $0x14] ss:$8 sps:$4 sm:$0xff]   ;;  %v3636_v23 = vld [vmem:[%s4209_s0 + $0x80] ss:$8 sps:$4 sm:$0xff]  }
 0x155   :  { %v716_v29 = vpack.c.bf16 %v699_v14, %v698_v34  ;;  %2413 = vmatprep.subr.bf16.mxu0 %v717_v7  ;;  %2941 = vmatprep.subr.bf16.mxu1 %v717_v7  ;;  %v694_v7 = vmul.f32 %v3430_v5, %v479_v54  ;;  %v707_v14 = vpack.c.bf16 %v681_v8, %v680_v44  ;;  %v3514_v54 = vpop.permute.xlu1 %597  ;;  %v3570_v8 = vld [vmem:[%s4209_s0 + $0x10] ss:$8 sps:$4 sm:$0xff]   ;;  %v3594_v44 = vld [vmem:[%s4209_s0 + $0x20] ss:$8 sps:$4 sm:$0xff]  }
 0x156   :  { %2414 = vmatpush3.bf16.msra.mxu0 %v709_v13  ;;  %2949 = vmatpush3.bf16.msra.mxu1 %v709_v13  ;;  %v679_v13 = vmul.f32 %v3444_v10, %v418_v40  ;;  %v690_v40 = vmul.f32 %v3455_v15, %v463_v50  ;;  %v688_v50 = vmul.f32 %v3487_v45, %v3463_v19 }
 0x157   :  { %2415 = vmatprep.subr.bf16.mxu0 %v716_v29  ;;  %2942 = vmatprep.subr.bf16.mxu1 %v716_v29  ;;  %v714_v29 = vpack.c.bf16 %v695_v25, %v694_v7  ;;  %v687_v47 = vmul.f32 %v3514_v54, %v3493_v48  ;;  %v3042_v48 = vld [vmem:[#allocation7 + $0x38] sm:$0xff]   ;;  %4302 = vst [vmem:[#allocation30_spill] sm:$0xff] %v3556_v22  ;;  %4304 = vst [vmem:[#allocation32_spill] sm:$0xff] %v3570_v8  ;;  %v3585_v25 = vld [vmem:[%s4209_s0 + $0x64] ss:$8 sps:$4 sm:$0xff]  }
 0x158   :  { %v706_v24 = vpack.c.bf16 %v679_v13, %v678_v39  ;;  %v712_v55 = vpack.c.bf16 %v691_v53, %v690_v40  ;;  %v711_v27 = vpack.c.bf16 %v689_v49, %v688_v50  ;;  %4307 = vst [vmem:[#allocation35_spill] sm:$0xff] %v3585_v25  ;;  %4308 = vst [vmem:[#allocation36_spill] sm:$0xff] %v3594_v44  ;;  %v3599_v7 = vld [vmem:[%s4209_s0 + $0x60] ss:$8 sps:$4 sm:$0xff]   ;;  %v3609_v13 = vld [vmem:[%s4209_s0 + $0x74] ss:$8 sps:$4 sm:$0xff]  }
 0x159   :  { %v3529_v35 = vpop.permute.xlu1 %517  ;;  %v710_v45 = vpack.c.bf16 %v687_v47, %v686_v31  ;;  %4309 = vst [vmem:[#allocation37_spill] sm:$0xff] %v3599_v7  ;;  %4311 = vst [vmem:[#allocation39_spill] sm:$0xff] %v3609_v13  ;;  %v3628_v39 = vld [vmem:[%s4209_s0 + $0x84] ss:$8 sps:$4 sm:$0xff]   ;;  %v3660_v40 = vld [vmem:[%s4209_s0 + $0xa0] ss:$8 sps:$4 sm:$0xff]  }
 0x15a   :  { %2416 = vmatpush3.bf16.msra.mxu0 %v708_v21  ;;  %2950 = vmatpush3.bf16.msra.mxu1 %v708_v21  ;;  %4297 = vst [vmem:[#allocation27_spill] sm:$0xff] %v3529_v35  ;;  %v3575_v21 = vld [vmem:[%s4209_s0 + $0x50] ss:$8 sps:$4 sm:$0xff]   ;;  %4312 = vst [vmem:[#allocation40_spill] sm:$0xff] %v3618_v42  ;;  %v3653_v53 = vld [vmem:[%s4209_s0 + $0xa4] ss:$8 sps:$4 sm:$0xff]  }
 0x15b   :  { %2417 = vmatprep.subr.bf16.mxu0 %v715_v26  ;;  %2943 = vmatprep.subr.bf16.mxu1 %v715_v26  ;;  %4305 = vst [vmem:[#allocation33_spill] sm:$0xff] %v3575_v21  ;;  %v3580_v26 = vld [vmem:[%s4209_s0 + $0x24] ss:$8 sps:$4 sm:$0xff]   ;;  %4314 = vst [vmem:[#allocation42_spill] sm:$0xff] %v3628_v39  ;;  %v3672_v49 = vld [vmem:[%s4209_s0 + $0xb0] ss:$8 sps:$4 sm:$0xff]  }
 0x15c   :  { %4306 = vst [vmem:[#allocation34_spill] sm:$0xff] %v3580_v26  ;;  %4315 = vst [vmem:[#allocation43_spill] sm:$0xff] %v3636_v23  ;;  %v3689_v50 = vld [vmem:[%s4209_s0 + $0xd4] ss:$8 sps:$4 sm:$0xff]   ;;  %v3696_v47 = vld [vmem:[%s4209_s0 + $0xd0] ss:$8 sps:$4 sm:$0xff]  }
 0x15d   :  { %4318 = vst [vmem:[#allocation46_spill] sm:$0xff] %v3653_v53  ;;  %4319 = vst [vmem:[#allocation47_spill] sm:$0xff] %v3660_v40  ;;  %v3701_v31 = vld [vmem:[%s4209_s0 + $0xe4] ss:$8 sps:$4 sm:$0xff]  }
 0x15e   :  { %2418 = vmatpush3.bf16.msra.mxu0 %v707_v14  ;;  %2951 = vmatpush3.bf16.msra.mxu1 %v707_v14  ;;  %v3604_v14 = vld [vmem:[%s4209_s0 + $0x34] ss:$8 sps:$4 sm:$0xff]   ;;  %4321 = vst [vmem:[#allocation49_spill] sm:$0xff] %v3672_v49  ;;  %4324 = vst [vmem:[#allocation52_spill] sm:$0xff] %v3689_v50 }
 0x15f   :  { %2419 = vmatprep.subr.bf16.mxu0 %v714_v29  ;;  %2944 = vmatprep.subr.bf16.mxu1 %v714_v29  ;;  %4310 = vst [vmem:[#allocation38_spill] sm:$0xff] %v3604_v14  ;;  %v3623_v29 = vld [vmem:[%s4209_s0 + $0x70] ss:$8 sps:$4 sm:$0xff]   ;;  %4325 = vst [vmem:[#allocation53_spill] sm:$0xff] %v3696_v47 }
 0x160   :  { %4313 = vst [vmem:[#allocation41_spill] sm:$0xff] %v3623_v29  ;;  %4326 = vst [vmem:[#allocation54_spill] sm:$0xff] %v3701_v31 }
 0x162   :  { %2420 = vmatpush3.bf16.msra.mxu0 %v706_v24  ;;  %2952 = vmatpush3.bf16.msra.mxu1 %v706_v24  ;;  %v3641_v24 = vld [vmem:[%s4209_s0 + $0x94] ss:$8 sps:$4 sm:$0xff]  }
 0x163   :  { %2421 = vmatprep.subr.bf16.mxu0 %v713_v37  ;;  %2945 = vmatprep.subr.bf16.mxu1 %v713_v37  ;;  %4316 = vst [vmem:[#allocation44_spill] sm:$0xff] %v3641_v24  ;;  %v3648_v37 = vld [vmem:[%s4209_s0 + $0x90] ss:$8 sps:$4 sm:$0xff]  }
 0x164   :  { %4317 = vst [vmem:[#allocation45_spill] sm:$0xff] %v3648_v37 }
 0x166   :  { %2422 = vmatpush3.bf16.msra.mxu0 %v3485_v36  ;;  %2953 = vmatpush3.bf16.msra.mxu1 %v3485_v36  ;;  %v671_v36 = vmul.f32 %v3529_v35, %v3475_v28  ;;  %v3551_v28 = vld [vmem:[%s4209_s0 + $0x40] ss:$8 sps:$4 sm:$0xff]  }
 0x167   :  { %2423 = vmatprep.subr.bf16.mxu0 %v712_v55  ;;  %2946 = vmatprep.subr.bf16.mxu1 %v712_v55  ;;  %4301 = vst [vmem:[#allocation29_spill] sm:$0xff] %v3551_v28  ;;  %v3677_v55 = vld [vmem:[%s4209_s0 + $0xc4] ss:$8 sps:$4 sm:$0xff]  }
 0x168   :  { %v702_v34 = vpack.c.bf16 %v671_v36, %v670_v32  ;;  %4322 = vst [vmem:[#allocation50_spill] sm:$0xff] %v3677_v55  ;;  %v3046_v36 = vld [vmem:[#allocation7 + $0x18] sm:$0xff]   ;;  %v3708_v32 = vld [vmem:[%s4209_s0 + $0xe0] ss:$8 sps:$4 sm:$0xff]  }
 0x169   :  { %4327 = vst [vmem:[#allocation55_spill] sm:$0xff] %v3708_v32 }
 0x16a   :  { %2424 = vmatpush3.bf16.msra.mxu0 %v704_v56  ;;  %2954 = vmatpush3.bf16.msra.mxu1 %v704_v56  ;;  %v3044_v56 = vld [vmem:[#allocation7 + $0x28] sm:$0xff]  }
 0x16b   :  { %2425 = vmatprep.subr.bf16.mxu0 %v711_v27  ;;  %2947 = vmatprep.subr.bf16.mxu1 %v711_v27  ;;  %v3045_v27 = vld [vmem:[#allocation7 + $0x20] sm:$0xff]  }
 0x16e   :  { %2426 = vmatpush3.bf16.msra.mxu0 %v4299_v33  ;;  %2955 = vmatpush3.bf16.msra.mxu1 %v4299_v33  ;;  %v3713_v33 = vld [vmem:[%s4209_s0 + $0xf4] ss:$8 sps:$4 sm:$0xff]  }
 0x16f   :  { %2427 = vmatprep.subr.bf16.mxu0 %v710_v45  ;;  %2948 = vmatprep.subr.bf16.mxu1 %v710_v45  ;;  %v3047_v45 = vld [vmem:[#allocation7 + $0x10] sm:$0xff]   ;;  %4328 = vst [vmem:[#allocation56_spill] sm:$0xff] %v3713_v33 }
 0x172   :  { %2428 = vmatpush3.bf16.msra.mxu0 %v702_v34  ;;  %2956 = vmatpush3.bf16.msra.mxu1 %v702_v34  ;;  %v3720_v34 = vld [vmem:[%s4209_s0 + $0xf0] ss:$8 sps:$4 sm:$0xff]  }
 0x173   :  { %2845 = vmatprep.subr.bf16.mxu0 %v3042_v48  ;;  %4329 = vst [vmem:[#allocation57_spill] sm:$0xff] %v3720_v34 }
 0x175   :  { %911 = vmatmul.mubr.bf16.vlgmr.msra.gmra.mxu0 %v3546_v46  ;;  %943 = vmatmul.mubr.bf16.vlgmr.msra.gmra.mxu1 %v3551_v28 }
 0x176   :  { %918 = vmatprep.mubr.bf16.mxu0 %v3556_v22  ;;  %950 = vmatprep.mubr.bf16.mxu1 %v3561_v43 }
 0x177   :  { %2846 = vmatpush3.bf16.msra.mxu0 %v3042_v48  ;;  %v3048_v48 = vld [vmem:[#allocation7 + $0x8] sm:$0xff]  }
 0x178   :  { %2847 = vmatprep.subr.bf16.mxu0 %v3043_v41 }
 0x17b   :  { %2848 = vmatpush3.bf16.msra.mxu0 %v3043_v41  ;;  %v3049_v41 = vld [vmem:[#allocation7] sm:$0xff]  }
 0x17c   :  { %2849 = vmatprep.subr.bf16.mxu0 %v3044_v56 }
 0x17d   :  { %919 = vmatmul.mubr.bf16.gmra.mxu0 %v3570_v8  ;;  %951 = vmatmul.mubr.bf16.gmra.mxu1 %v3575_v21 }
 0x17e   :  { %926 = vmatprep.mubr.bf16.mxu0 %v3580_v26  ;;  %958 = vmatprep.mubr.bf16.mxu1 %v3585_v25 }
 0x17f   :  { %2850 = vmatpush3.bf16.msra.mxu0 %v3044_v56 }
 0x180   :  { %2851 = vmatprep.subr.bf16.mxu0 %v3045_v27 }
 0x183   :  { %2852 = vmatpush3.bf16.msra.mxu0 %v3045_v27 }
 0x184   :  { %2853 = vmatprep.subr.bf16.mxu0 %v3046_v36 }
 0x185   :  { %927 = vmatmul.mubr.bf16.gmra.mxu0 %v3594_v44  ;;  %959 = vmatmul.mubr.bf16.gmra.mxu1 %v3599_v7 }
 0x186   :  { %934 = vmatprep.mubr.bf16.mxu0 %v3604_v14  ;;  %966 = vmatprep.mubr.bf16.mxu1 %v3609_v13 }
 0x187   :  { %2854 = vmatpush3.bf16.msra.mxu0 %v3046_v36 }
 0x188   :  { %2855 = vmatprep.subr.bf16.mxu0 %v3047_v45 }
 0x18b   :  { %2856 = vmatpush3.bf16.msra.mxu0 %v3047_v45 }
 0x18c   :  { %2857 = vmatprep.subr.bf16.mxu0 %v3048_v48 }
 0x18d   :  { %935 = vmatmul.mubr.bf16.gmra.mxu0 %v3618_v42  ;;  %967 = vmatmul.mubr.bf16.gmra.mxu1 %v3623_v29 }
 0x18e   :  { %974 = vmatprep.mubr.bf16.mxu1 %v3628_v39 }
 0x18f   :  { %2858 = vmatpush3.bf16.msra.mxu0 %v3048_v48 }
 0x190   :  { %2859 = vmatprep.subr.bf16.mxu0 %v3049_v41 }
 0x193   :  { %2860 = vmatpush3.bf16.msra.mxu0 %v3049_v41 }
 0x195   :  { %975 = vmatmul.mubr.bf16.gmra.mxu1 %v3636_v23  ;;  %v4330_v23 = vld [vmem:[#allocation24_spill] sm:$0xff] }
 0x196   :  { %982 = vmatprep.mubr.bf16.mxu1 %v3641_v24 }
 0x19d   :  { %983 = vmatmul.mubr.bf16.gmra.mxu1 %v3648_v37 }
 0x19e   :  { %990 = vmatprep.mubr.bf16.mxu1 %v3653_v53 }
 0x1a5   :  { %991 = vmatmul.mubr.bf16.gmra.mxu1 %v3660_v40 }
 0x1a6   :  { %998 = vmatprep.mubr.bf16.mxu1 %v3665_v38 }
 0x1ad   :  { %999 = vmatmul.mubr.bf16.gmra.mxu1 %v3672_v49 }
 0x1ae   :  { %1006 = vmatprep.mubr.bf16.mxu1 %v3677_v55 }
 0x1b5   :  { %1007 = vmatmul.mubr.bf16.gmra.mxu1 %v3684_v52  ;;  %v3727_v52 = vld [vmem:[%s4213_s4] ss:$0 sm:$0xff] }
 0x1b6   :  { %1014 = vmatprep.mubr.bf16.mxu1 %v3689_v50 }
 0x1bd   :  { %1015 = vmatmul.mubr.bf16.gmra.mxu1 %v3696_v47 }
 0x1be   :  { %1022 = vmatprep.mubr.bf16.mxu1 %v3701_v31 }
 0x1c5   :  { %1023 = vmatmul.mubr.bf16.gmra.mxu1 %v3708_v32 }
 0x1c6   :  { %1030 = vmatprep.mubr.bf16.mxu1 %v3713_v33 }
 0x1cd   :  { %1031 = vmatmul.mubr.bf16.gmra.mxu1 %v3720_v34 }
 0x235   :  { %v2429_v56 = vpop.f32.mrf.mxu0  ;;  %v2453_v27 = vpop.f32.mrf.mxu1 }
 0x237   :  { %v2430_v36 = vpop.f32.mrf.mxu0  ;;  %v2454_v45 = vpop.f32.mrf.mxu1 }
 0x238   :  { %v2431_v31 = vadd.f32 %v2430_v36, %v2429_v56 }
 0x239   :  { %v2432_v32 = vpop.f32.mrf.mxu0  ;;  %v2456_v47 = vpop.f32.mrf.mxu1 }
 0x23a   :  { %v1039_v33 = vmul.f32 %v2431_v31, %v3533_v30 }
 0x23b   :  { %v2433_v48 = vpop.f32.mrf.mxu0  ;;  %v2457_v50 = vpop.f32.mrf.mxu1 }
 0x23c   :  { %v2434_v55 = vadd.f32 %v2433_v48, %v2432_v32  ;;  %v1077_v38 = vadd.f32 %v3727_v52, %v1039_v33  ;;  %v4331_v33 = vld [vmem:[#allocation25_spill] sm:$0xff] }
 0x23d   :  { %v2435_v41 = vpop.f32.mrf.mxu0  ;;  %v2459_v49 = vpop.f32.mrf.mxu1 }
 0x23e   :  { %v1040_v34 = vmul.f32 %v2434_v55, %v3529_v35  ;;  %v1109_v29 = vmax.f32 %v1077_v38, 0.0 }
 0x23f   :  { %v2436_v40 = vpop.f32.mrf.mxu0  ;;  %v2460_v56 = vpop.f32.mrf.mxu1 }
 0x240   :  { %v1078_v36 = vadd.f32 %v3727_v52, %v1040_v34  ;;  %v2437_v53 = vadd.f32 %v2436_v40, %v2435_v41 }
 0x241   :  { %v2438_v31 = vpop.f32.mrf.mxu0  ;;  %v2462_v37 = vpop.f32.mrf.mxu1 }
 0x242   :  { %v1110_v24 = vmax.f32 %v1078_v36, 0.0  ;;  %v1041_v39 = vmul.f32 %v2437_v53, %v4330_v23 }
 0x243   :  { %v2439_v13 = vpop.f32.mrf.mxu0  ;;  %v2463_v7 = vpop.f32.mrf.mxu1 }
 0x244   :  { %v2440_v32 = vadd.f32 %v2439_v13, %v2438_v31  ;;  %v1141_v21 = vpack.c.bf16 %v1110_v24, %v1109_v29  ;;  %v1079_v55 = vadd.f32 %v3727_v52, %v1041_v39  ;;  %v2458_v24 = vadd.f32 %v2457_v50, %v2456_v47 }
 0x245   :  { %v2441_v48 = vpop.f32.mrf.mxu0  ;;  %v2465_v25 = vpop.f32.mrf.mxu1 }
 0x246   :  { %v1042_v43 = vmul.f32 %v2440_v32, %v4331_v33  ;;  %2861 = vmatprep.mubr.bf16.mxu0 %v1141_v21  ;;  %v1111_v53 = vmax.f32 %v1079_v55, 0.0  ;;  %v2455_v32 = vadd.f32 %v2454_v45, %v2453_v27  ;;  %v2464_v27 = vadd.f32 %v2463_v7, %v2462_v37 }
 0x247   :  { %v2442_v28 = vpop.f32.mrf.mxu0  ;;  %v2466_v34 = vpop.f32.mrf.mxu1 }
 0x248   :  { %v1080_v40 = vadd.f32 %v3727_v52, %v1042_v43  ;;  %v2443_v41 = vadd.f32 %v2442_v28, %v2441_v48  ;;  %v1047_v47 = vmul.f32 %v2455_v32, %v3442_v9 }
 0x249   :  { %v2444_v36 = vpop.f32.mrf.mxu0  ;;  %v2468_v42 = vpop.f32.mrf.mxu1 }
 0x24a   :  { %v1112_v38 = vmax.f32 %v1080_v40, 0.0  ;;  %v1043_v14 = vmul.f32 %v2443_v41, %v3459_v17  ;;  %v1048_v41 = vmul.f32 %v2458_v24, %v3444_v10 }
 0x24b   :  { %v2445_v13 = vpop.f32.mrf.mxu0  ;;  %v2469_v31 = vpop.f32.mrf.mxu1 }
 0x24c   :  { %v1142_v44 = vpack.c.bf16 %v1112_v38, %v1111_v53  ;;  %v2446_v29 = vadd.f32 %v2445_v13, %v2444_v36  ;;  %v1081_v43 = vadd.f32 %v3727_v52, %v1043_v14  ;;  %v4332_v36 = vld [vmem:[#allocation20_spill] sm:$0xff]  ;;  %v1086_v14 = vadd.f32 %v3727_v52, %v1048_v41 }
 0x24d   :  { %v2447_v39 = vpop.f32.mrf.mxu0  ;;  %v2471_v26 = vpop.f32.mrf.mxu1 }
 0x24e   :  { %v1044_v21 = vmul.f32 %v2446_v29, %v3461_v18  ;;  %2862 = vmatmul.mubr.bf16.vlgmr.msra.gmra.mxu0 %v1142_v44  ;;  %v1113_v38 = vmax.f32 %v1081_v43, 0.0  ;;  %v2470_v29 = vadd.f32 %v2469_v31, %v2468_v42  ;;  %v1050_v43 = vmul.f32 %v2464_v27, %v3428_v4 }
 0x24f   :  { %v2448_v28 = vpop.f32.mrf.mxu0  ;;  %v2472_v48 = vpop.f32.mrf.mxu1  ;;  %v1118_v42 = vmax.f32 %v1086_v14, 0.0 }
 0x250   :  { %v1082_v55 = vadd.f32 %v3727_v52, %v1044_v21  ;;  %v2449_v40 = vadd.f32 %v2448_v28, %v2447_v39  ;;  %v2461_v39 = vadd.f32 %v2460_v56, %v2459_v49  ;;  %v4333_v28 = vld [vmem:[#allocation21_spill] sm:$0xff]  ;;  %v2473_v14 = vadd.f32 %v2472_v48, %v2471_v26 }
 0x251   :  { %v2450_v8 = vpop.f32.mrf.mxu0  ;;  %v2474_v22 = vpop.f32.mrf.mxu1 }
 0x252   :  { %v1114_v53 = vmax.f32 %v1082_v55, 0.0  ;;  %v1045_v50 = vmul.f32 %v2449_v40, %v4332_v36  ;;  %v1085_v55 = vadd.f32 %v3727_v52, %v1047_v47  ;;  %v2467_v40 = vadd.f32 %v2466_v34, %v2465_v25 }
 0x253   :  { %v2451_v13 = vpop.f32.mrf.mxu0  ;;  %v2475_v44 = vpop.f32.mrf.mxu1  ;;  %v1049_v31 = vmul.f32 %v2461_v39, %v3426_v3  ;;  %v1088_v25 = vadd.f32 %v3727_v52, %v1050_v43 }
 0x254   :  { %v2452_v45 = vadd.f32 %v2451_v13, %v2450_v8  ;;  %v1143_v21 = vpack.c.bf16 %v1114_v53, %v1113_v38  ;;  %v1083_v24 = vadd.f32 %v3727_v52, %v1045_v50  ;;  %v1052_v8 = vmul.f32 %v2470_v29, %v3420_v0 }
 0x255   :  { %v2477_v46 = vpop.f32.mrf.mxu1  ;;  %v1117_v41 = vmax.f32 %v1085_v55, 0.0  ;;  %v1051_v53 = vmul.f32 %v2467_v40, %v3418_v63  ;;  %v2476_v34 = vadd.f32 %v2475_v44, %v2474_v22  ;;  %v1120_v55 = vmax.f32 %v1088_v25, 0.0 }
 0x256   :  { %v1046_v10 = vmul.f32 %v2452_v45, %v4333_v28  ;;  %2865 = vmatprep.mubr.bf16.mxu0 %v1143_v21  ;;  %v1115_v49 = vmax.f32 %v1083_v24, 0.0  ;;  %v1090_v38 = vadd.f32 %v3727_v52, %v1052_v8  ;;  %v1087_v45 = vadd.f32 %v3727_v52, %v1049_v31 }
 0x257   :  { %v2478_v32 = vpop.f32.mrf.mxu1  ;;  %v1145_v27 = vpack.c.bf16 %v1118_v42, %v1117_v41  ;;  %v1089_v29 = vadd.f32 %v3727_v52, %v1051_v53  ;;  %v1054_v24 = vmul.f32 %v2476_v34, %v3412_v60 }
 0x258   :  { %v1084_v7 = vadd.f32 %v3727_v52, %v1046_v10  ;;  %v2479_v21 = vadd.f32 %v2478_v32, %v2477_v46  ;;  %v1122_v40 = vmax.f32 %v1090_v38, 0.0  ;;  %v1119_v43 = vmax.f32 %v1087_v45, 0.0 }
 0x259   :  { %v2480_v37 = vpop.f32.mrf.mxu1  ;;  %v1121_v8 = vmax.f32 %v1089_v29, 0.0  ;;  %v1092_v48 = vadd.f32 %v3727_v52, %v1054_v24 }
 0x25a   :  { %v1116_v56 = vmax.f32 %v1084_v7, 0.0  ;;  %v1053_v7 = vmul.f32 %v2473_v14, %v3408_v58  ;;  %v1146_v46 = vpack.c.bf16 %v1120_v55, %v1119_v43 }
 0x25b   :  { %v2481_v50 = vpop.f32.mrf.mxu1 }
 0x25c   :  { %v1144_v47 = vpack.c.bf16 %v1116_v56, %v1115_v49  ;;  %v2482_v13 = vadd.f32 %v2481_v50, %v2480_v37  ;;  %v1055_v37 = vmul.f32 %v2479_v21, %v3519_v51  ;;  %v1147_v49 = vpack.c.bf16 %v1122_v40, %v1121_v8 }
 0x25d   :  { %v2483_v10 = vpop.f32.mrf.mxu1  ;;  %v1091_v56 = vadd.f32 %v3727_v52, %v1053_v7 }
 0x25e   :  { %2866 = vmatmul.mubr.bf16.gmra.mxu0 %v1144_v47  ;;  %v1056_v22 = vmul.f32 %v2482_v13, %v3514_v54  ;;  %v1093_v53 = vadd.f32 %v3727_v52, %v1055_v37  ;;  %v1124_v47 = vmax.f32 %v1092_v48, 0.0 }
 0x25f   :  { %v2484_v39 = vpop.f32.mrf.mxu1  ;;  %2869 = vmatprep.mubr.bf16.mxu0 %v1145_v27  ;;  %v1123_v27 = vmax.f32 %v1091_v56, 0.0 }
 0x260   :  { %v1094_v32 = vadd.f32 %v3727_v52, %v1056_v22  ;;  %v2485_v41 = vadd.f32 %v2484_v39, %v2483_v10  ;;  %v1125_v29 = vmax.f32 %v1093_v53, 0.0 }
 0x261   :  { %v2486_v44 = vpop.f32.mrf.mxu1  ;;  %v1148_v24 = vpack.c.bf16 %v1124_v47, %v1123_v27 }
 0x262   :  { %v1126_v13 = vmax.f32 %v1094_v32, 0.0  ;;  %v1057_v45 = vmul.f32 %v2485_v41, %v3463_v19 }
 0x263   :  { %v2487_v26 = vpop.f32.mrf.mxu1 }
 0x264   :  { %v2488_v42 = vadd.f32 %v2487_v26, %v2486_v44  ;;  %v1149_v22 = vpack.c.bf16 %v1126_v13, %v1125_v29  ;;  %v1095_v44 = vadd.f32 %v3727_v52, %v1057_v45 }
 0x265   :  { %v2489_v31 = vpop.f32.mrf.mxu1 }
 0x266   :  { %2870 = vmatmul.mubr.bf16.gmra.mxu0 %v1146_v46  ;;  %v1058_v25 = vmul.f32 %v2488_v42, %v3465_v20  ;;  %v1127_v42 = vmax.f32 %v1095_v44, 0.0 }
 0x267   :  { %v2490_v50 = vpop.f32.mrf.mxu1  ;;  %2873 = vmatprep.mubr.bf16.mxu0 %v1147_v49 }
 0x268   :  { %v2491_v34 = vadd.f32 %v2490_v50, %v2489_v31  ;;  %v1096_v10 = vadd.f32 %v3727_v52, %v1058_v25 }
 0x269   :  { %v2492_v38 = vpop.f32.mrf.mxu1 }
 0x26a   :  { %v1059_v14 = vmul.f32 %v2491_v34, %v3455_v15  ;;  %v1128_v26 = vmax.f32 %v1096_v10, 0.0 }
 0x26b   :  { %v2493_v21 = vpop.f32.mrf.mxu1 }
 0x26c   :  { %v2494_v39 = vadd.f32 %v2493_v21, %v2492_v38  ;;  %v1097_v40 = vadd.f32 %v3727_v52, %v1059_v14  ;;  %v1150_v41 = vpack.c.bf16 %v1128_v26, %v1127_v42 }
 0x26d   :  { %v2495_v55 = vpop.f32.mrf.mxu1 }
 0x26e   :  { %v1060_v43 = vmul.f32 %v2494_v39, %v3457_v16  ;;  %2874 = vmatmul.mubr.bf16.gmra.mxu0 %v1148_v24  ;;  %v1129_v46 = vmax.f32 %v1097_v40, 0.0 }
 0x26f   :  { %v2496_v7 = vpop.f32.mrf.mxu1  ;;  %2877 = vmatprep.mubr.bf16.mxu0 %v1149_v22 }
 0x270   :  { %v1098_v8 = vadd.f32 %v3727_v52, %v1060_v43  ;;  %v2497_v37 = vadd.f32 %v2496_v7, %v2495_v55 }
 0x271   :  { %v2498_v48 = vpop.f32.mrf.mxu1 }
 0x272   :  { %v1061_v32 = vmul.f32 %v2497_v37, %v3447_v11  ;;  %v1130_v31 = vmax.f32 %v1098_v8, 0.0 }
 0x273   :  { %v2499_v49 = vpop.f32.mrf.mxu1 }
 0x274   :  { %v2500_v56 = vadd.f32 %v2499_v49, %v2498_v48  ;;  %v1151_v53 = vpack.c.bf16 %v1130_v31, %v1129_v46  ;;  %v1099_v25 = vadd.f32 %v3727_v52, %v1061_v32 }
 0x275   :  { %v2501_v50 = vpop.f32.mrf.mxu1 }
 0x276   :  { %v1062_v34 = vmul.f32 %v2500_v56, %v3449_v12  ;;  %2878 = vmatmul.mubr.bf16.gmra.mxu0 %v1150_v41  ;;  %v1131_v45 = vmax.f32 %v1099_v25, 0.0 }
 0x277   :  { %v2502_v47 = vpop.f32.mrf.mxu1  ;;  %2881 = vmatprep.mubr.bf16.mxu0 %v1151_v53 }
 0x278   :  { %v1100_v38 = vadd.f32 %v3727_v52, %v1062_v34  ;;  %v2503_v13 = vadd.f32 %v2502_v47, %v2501_v50 }
 0x279   :  { %v2504_v27 = vpop.f32.mrf.mxu1 }
 0x27a   :  { %v1063_v14 = vmul.f32 %v2503_v13, %v3430_v5  ;;  %v1132_v29 = vmax.f32 %v1100_v38, 0.0 }
 0x27b   :  { %v2505_v21 = vpop.f32.mrf.mxu1 }
 0x27c   :  { %v2506_v10 = vadd.f32 %v2505_v21, %v2504_v27  ;;  %v1152_v39 = vpack.c.bf16 %v1132_v29, %v1131_v45  ;;  %v1101_v55 = vadd.f32 %v3727_v52, %v1063_v14 }
 0x27d   :  { %v2507_v24 = vpop.f32.mrf.mxu1 }
 0x27e   :  { %v1064_v22 = vmul.f32 %v2506_v10, %v3432_v6  ;;  %2882 = vmatmul.mubr.bf16.gmra.mxu0 %v1152_v39  ;;  %v1133_v8 = vmax.f32 %v1101_v55, 0.0 }
 0x27f   :  { %v2508_v44 = vpop.f32.mrf.mxu1 }
 0x280   :  { %v1102_v40 = vadd.f32 %v3727_v52, %v1064_v22  ;;  %v2509_v43 = vadd.f32 %v2508_v44, %v2507_v24 }
 0x281   :  { %v2510_v7 = vpop.f32.mrf.mxu1 }
 0x282   :  { %v1134_v37 = vmax.f32 %v1102_v40, 0.0  ;;  %v1065_v26 = vmul.f32 %v2509_v43, %v3422_v1 }
 0x283   :  { %v2511_v48 = vpop.f32.mrf.mxu1 }
 0x284   :  { %v2512_v42 = vadd.f32 %v2511_v48, %v2510_v7  ;;  %v1153_v46 = vpack.c.bf16 %v1134_v37, %v1133_v8  ;;  %v1103_v31 = vadd.f32 %v3727_v52, %v1065_v26 }
 0x285   :  { %v2513_v32 = vpop.f32.mrf.mxu1 }
 0x286   :  { %v1066_v49 = vmul.f32 %v2512_v42, %v3424_v2  ;;  %2885 = vmatprep.mubr.bf16.mxu0 %v1153_v46  ;;  %v1135_v25 = vmax.f32 %v1103_v31, 0.0 }
 0x287   :  { %v2514_v56 = vpop.f32.mrf.mxu1 }
 0x288   :  { %v1104_v41 = vadd.f32 %v3727_v52, %v1066_v49  ;;  %v2515_v53 = vadd.f32 %v2514_v56, %v2513_v32  ;;  %v4334_v32 = vld [vmem:[#allocation18_spill] sm:$0xff] }
 0x289   :  { %v2516_v50 = vpop.f32.mrf.mxu1 }
 0x28a   :  { %v1136_v34 = vmax.f32 %v1104_v41, 0.0  ;;  %v1067_v47 = vmul.f32 %v2515_v53, %v3414_v61 }
 0x28b   :  { %v2517_v38 = vpop.f32.mrf.mxu1 }
 0x28c   :  { %v2518_v13 = vadd.f32 %v2517_v38, %v2516_v50  ;;  %v1154_v27 = vpack.c.bf16 %v1136_v34, %v1135_v25  ;;  %v1105_v14 = vadd.f32 %v3727_v52, %v1067_v47 }
 0x28d   :  { %v2519_v45 = vpop.f32.mrf.mxu1 }
 0x28e   :  { %v1068_v29 = vmul.f32 %v2518_v13, %v3416_v62  ;;  %2886 = vmatmul.mubr.bf16.gmra.mxu0 %v1154_v27  ;;  %v1137_v55 = vmax.f32 %v1105_v14, 0.0 }
 0x28f   :  { %v2520_v21 = vpop.f32.mrf.mxu1 }
 0x290   :  { %v1106_v10 = vadd.f32 %v3727_v52, %v1068_v29  ;;  %v2521_v39 = vadd.f32 %v2520_v21, %v2519_v45 }
 0x291   :  { %v2522_v24 = vpop.f32.mrf.mxu1 }
 0x292   :  { %v1138_v22 = vmax.f32 %v1106_v10, 0.0  ;;  %v1069_v44 = vmul.f32 %v2521_v39, %v3406_v57 }
 0x293   :  { %v2523_v40 = vpop.f32.mrf.mxu1 }
 0x294   :  { %v2524_v43 = vadd.f32 %v2523_v40, %v2522_v24  ;;  %v1155_v7 = vpack.c.bf16 %v1138_v22, %v1137_v55  ;;  %v1107_v8 = vadd.f32 %v3727_v52, %v1069_v44 }
 0x296   :  { %v1070_v37 = vmul.f32 %v2524_v43, %v3410_v59  ;;  %2889 = vmatprep.mubr.bf16.mxu0 %v1155_v7  ;;  %v1139_v48 = vmax.f32 %v1107_v8, 0.0 }
 0x298   :  { %v1108_v26 = vadd.f32 %v3727_v52, %v1070_v37 }
 0x29a   :  { %v1140_v42 = vmax.f32 %v1108_v26, 0.0 }
 0x29c   :  { %v1156_v46 = vpack.c.bf16 %v1140_v42, %v1139_v48 }
 0x29e   :  { %2890 = vmatmul.mubr.bf16.gmra.mxu0 %v1156_v46 }
 0x29f   :  { %1463 = vmatprep.mubr.bf16.mxu0 %v4334_v32 }
 0x30e   :  { %v2863_v31 = vpop.f32.mrf.mxu0 }
 0x30f   :  { %v3794_v41 = vmul.f32 %v2863_v31, %v4330_v23 }
 0x310   :  { %v1256_v49 = vpop.f32.mrf.mxu0 }
 0x311   :  { %v3800_v25 = vmul.f32 %v1256_v49, %v3533_v30 }
 0x312   :  { %v2864_v56 = vpop.f32.mrf.mxu0 }
 0x313   :  { %v3797_v53 = vmul.f32 %v2864_v56, %v4331_v33  ;;  %4335 = vst [vmem:[#allocation18_spill] sm:$0xff] %v3800_v25 }
 0x314   :  { %v1259_v50 = vpop.f32.mrf.mxu0 }
 0x315   :  { %v3805_v34 = vmul.f32 %v1259_v50, %v3529_v35 }
 0x317   :  { %4336 = vst [vmem:[#allocation58_spill] sm:$0xff] %v3805_v34 }
 0x31e   :  { %v2867_v38 = vpop.f32.mrf.mxu0 }
 0x31f   :  { %v3810_v45 = vmul.f32 %v2867_v38, %v4332_v36 }
 0x320   :  { %v1272_v13 = vpop.f32.mrf.mxu0 }
 0x321   :  { %v3816_v21 = vmul.f32 %v1272_v13, %v3459_v17 }
 0x322   :  { %v2868_v27 = vpop.f32.mrf.mxu0 }
 0x323   :  { %v3813_v14 = vmul.f32 %v2868_v27, %v4333_v28 }
 0x324   :  { %v1275_v29 = vpop.f32.mrf.mxu0 }
 0x325   :  { %v3821_v39 = vmul.f32 %v1275_v29, %v3461_v18 }
 0x326   :  { %v2871_v24 = vpop.f32.mrf.mxu0 }
 0x328   :  { %v1288_v22 = vpop.f32.mrf.mxu0 }
 0x32a   :  { %v2872_v44 = vpop.f32.mrf.mxu0 }
 0x32c   :  { %v1291_v40 = vpop.f32.mrf.mxu0 }
 0x32e   :  { %v2875_v43 = vpop.f32.mrf.mxu0 }
 0x32f   :  { %v1397_v36 = vmul.f32 %v2875_v43, %v3408_v58  ;;  %v1394_v43 = vmul.f32 %v2872_v44, %v3428_v4 }
 0x330   :  { %v1304_v7 = vpop.f32.mrf.mxu0 }
 0x332   :  { %v2876_v8 = vpop.f32.mrf.mxu0 }
 0x333   :  { %v1398_v52 = vmul.f32 %v2876_v8, %v3412_v60  ;;  %v1395_v8 = vmul.f32 %v1304_v7, %v3418_v63 }
 0x334   :  { %v1307_v37 = vpop.f32.mrf.mxu0 }
 0x335   :  { %v1422_v35 = vpack.c.bf16 %v1398_v52, %v1397_v36  ;;  %v1396_v30 = vmul.f32 %v1307_v37, %v3420_v0  ;;  %v4338_v37 = vpack.c.bf16 %v3813_v14, %v3810_v45  ;;  %v4340_v45 = vpack.c.bf16 %v3797_v53, %v3794_v41  ;;  %v4341_v14 = vld [vmem:[#allocation58_spill] sm:$0xff]  ;;  %v4350_v53 = vld [vmem:[#allocation40_spill] sm:$0xff] }
 0x336   :  { %v2879_v26 = vpop.f32.mrf.mxu0  ;;  %v4349_v41 = vld [vmem:[#allocation38_spill] sm:$0xff] }
 0x338   :  { %v1320_v48 = vpop.f32.mrf.mxu0 }
 0x33a   :  { %v2880_v42 = vpop.f32.mrf.mxu0 }
 0x33b   :  { %v1402_v7 = vmul.f32 %v2880_v42, %v3465_v20  ;;  %v3050_v42 = vld [vmem:[#allocation8 + $0x38] sm:$0xff]  }
 0x33c   :  { %v1323_v46 = vpop.f32.mrf.mxu0  ;;  %2893 = vmatprep.subr.bf16.mxu1 %v3050_v42 }
 0x33d   :  { %2894 = vmatpush3.bf16.msra.mxu1 %v3050_v42  ;;  %v4372_v42 = vld [vmem:[#allocation55_spill] sm:$0xff] }
 0x33e   :  { %v2883_v32 = vpop.f32.mrf.mxu0 }
 0x340   :  { %v1336_v31 = vpop.f32.mrf.mxu0 }
 0x341   :  { %v1403_v44 = vmul.f32 %v1336_v31, %v3455_v15  ;;  %v1399_v31 = vmul.f32 %v1320_v48, %v3519_v51  ;;  %v4346_v48 = vld [vmem:[#allocation32_spill] sm:$0xff] }
 0x342   :  { %v2884_v49 = vpop.f32.mrf.mxu0 }
 0x344   :  { %v1339_v56 = vpop.f32.mrf.mxu0 }
 0x34e   :  { %v2887_v50 = vpop.f32.mrf.mxu0 }
 0x350   :  { %v1352_v38 = vpop.f32.mrf.mxu0 }
 0x351   :  { %v1407_v36 = vmul.f32 %v1352_v38, %v3430_v5  ;;  %v3051_v38 = vld [vmem:[#allocation8 + $0x30] sm:$0xff]  }
 0x352   :  { %v2888_v13 = vpop.f32.mrf.mxu0  ;;  %2895 = vmatprep.subr.bf16.mxu1 %v3051_v38 }
 0x353   :  { %v1410_v25 = vmul.f32 %v2888_v13, %v3424_v2  ;;  %2896 = vmatpush3.bf16.msra.mxu1 %v3051_v38  ;;  %v4347_v13 = vld [vmem:[#allocation34_spill] sm:$0xff]  ;;  %v4373_v38 = vld [vmem:[#allocation56_spill] sm:$0xff] }
 0x354   :  { %v1355_v27 = vpop.f32.mrf.mxu0 }
 0x35e   :  { %v2891_v29 = vpop.f32.mrf.mxu0 }
 0x35f   :  { %v1413_v10 = vmul.f32 %v2891_v29, %v3406_v57  ;;  %v1421_v29 = vpack.c.bf16 %v1396_v30, %v1395_v8  ;;  %v1405_v30 = vmul.f32 %v2883_v32, %v3447_v11  ;;  %v3871_v8 = vld [vmem:[%s4209_s0 + $0x44] ss:$8 sps:$4 sm:$0xff]  }
 0x360   :  { %v1368_v47 = vpop.f32.mrf.mxu0 }
 0x361   :  { %v1411_v17 = vmul.f32 %v1368_v47, %v3414_v61 }
 0x362   :  { %v2892_v55 = vpop.f32.mrf.mxu0 }
 0x363   :  { %v1414_v28 = vmul.f32 %v2892_v55, %v3410_v59  ;;  %v1409_v55 = vmul.f32 %v2887_v50, %v3422_v1 }
 0x364   :  { %v1371_v18 = vpop.f32.mrf.mxu0 }
 0x365   :  { %v1430_v33 = vpack.c.bf16 %v1414_v28, %v1413_v10  ;;  %v1412_v23 = vmul.f32 %v1371_v18, %v3416_v62  ;;  %v1428_v47 = vpack.c.bf16 %v1410_v25, %v1409_v55  ;;  %v1408_v28 = vmul.f32 %v1355_v27, %v3432_v6  ;;  %v4348_v27 = vld [vmem:[#allocation36_spill] sm:$0xff]  ;;  %v4352_v55 = vld [vmem:[#allocation29_spill] sm:$0xff] }
 0x366   :  { %v1393_v18 = vmul.f32 %v2871_v24, %v3426_v3  ;;  %v1404_v24 = vmul.f32 %v1339_v56, %v3457_v16  ;;  %v4339_v56 = vpack.c.bf16 %v3821_v39, %v3816_v21  ;;  %v4344_v21 = vld [vmem:[#allocation26_spill] sm:$0xff] }
 0x367   :  { %v1429_v34 = vpack.c.bf16 %v1412_v23, %v1411_v17  ;;  %2549 = vmatprep.subr.bf16.mxu0 %v1430_v33  ;;  %v4337_v23 = vld [vmem:[#allocation19_spill] sm:$0xff]  ;;  %v1427_v52 = vpack.c.bf16 %v1408_v28, %v1407_v36  ;;  %v4345_v39 = vld [vmem:[#allocation30_spill] sm:$0xff]  ;;  %v4356_v28 = vld [vmem:[#allocation37_spill] sm:$0xff] }
 0x368   :  { %2550 = vmatpush3.bf16.msra.mxu0 %v1422_v35  ;;  %v1420_v17 = vpack.c.bf16 %v1394_v43, %v1393_v18  ;;  %v1392_v33 = vmul.f32 %v1291_v40, %v4337_v23  ;;  %v1406_v35 = vmul.f32 %v2884_v49, %v3449_v12  ;;  %v1425_v40 = vpack.c.bf16 %v1404_v24, %v1403_v44  ;;  %v4353_v43 = vld [vmem:[#allocation31_spill] sm:$0xff]  ;;  %v4358_v36 = vld [vmem:[#allocation41_spill] sm:$0xff]  ;;  %v3055_v24 = vld [vmem:[#allocation8 + $0x10] sm:$0xff]  }
 0x369   :  { %2551 = vmatprep.subr.bf16.mxu0 %v1429_v34  ;;  %v1391_v34 = vmul.f32 %v1288_v22, %v3442_v9  ;;  %v1401_v22 = vmul.f32 %v2879_v26, %v3463_v19  ;;  %v1400_v49 = vmul.f32 %v1323_v46, %v3514_v54  ;;  %v4342_v26 = vld [vmem:[#allocation18_spill] sm:$0xff]  ;;  %4351 = vst [vmem:[#allocation19_spill] sm:$0xff] %v3871_v8  ;;  %v4357_v18 = vld [vmem:[#allocation39_spill] sm:$0xff] }
 0x36a   :  { %v1426_v10 = vpack.c.bf16 %v1406_v35, %v1405_v30  ;;  %v4343_v46 = vpack.c.bf16 %v4341_v14, %v4342_v26  ;;  %v3052_v35 = vld [vmem:[#allocation8 + $0x28] sm:$0xff]   ;;  %v4362_v30 = vld [vmem:[#allocation45_spill] sm:$0xff] }
 0x36b   :  { %v1419_v25 = vpack.c.bf16 %v1392_v33, %v1391_v34  ;;  %v1424_v32 = vpack.c.bf16 %v1402_v7, %v1401_v22  ;;  %v1423_v50 = vpack.c.bf16 %v1400_v49, %v1399_v31  ;;  %v4360_v33 = vld [vmem:[#allocation43_spill] sm:$0xff]  ;;  %2897 = vmatprep.subr.bf16.mxu1 %v3052_v35  ;;  %v3053_v34 = vld [vmem:[#allocation8 + $0x20] sm:$0xff]   ;;  %v4366_v22 = vld [vmem:[#allocation49_spill] sm:$0xff] }
 0x36c   :  { %2552 = vmatpush3.bf16.msra.mxu0 %v1421_v29  ;;  %v4354_v29 = vld [vmem:[#allocation33_spill] sm:$0xff]  ;;  %2898 = vmatpush3.bf16.msra.mxu1 %v3052_v35  ;;  %v4364_v44 = vld [vmem:[#allocation47_spill] sm:$0xff]  ;;  %v4377_v35 = vld [vmem:[#allocation24_spill] sm:$0xff] }
 0x36d   :  { %2553 = vmatprep.subr.bf16.mxu0 %v1428_v47  ;;  %v4355_v47 = vld [vmem:[#allocation35_spill] sm:$0xff]  ;;  %2899 = vmatprep.subr.bf16.mxu1 %v3053_v34  ;;  %v4370_v31 = vld [vmem:[#allocation53_spill] sm:$0xff] }
 0x36e   :  { %v3056_v7 = vld [vmem:[#allocation8 + $0x8] sm:$0xff]  }
 0x36f   :  { %v4368_v49 = vld [vmem:[#allocation51_spill] sm:$0xff] }
 0x370   :  { %2554 = vmatpush3.bf16.msra.mxu0 %v1420_v17  ;;  %v4359_v17 = vld [vmem:[#allocation42_spill] sm:$0xff]  ;;  %2900 = vmatpush3.bf16.msra.mxu1 %v3053_v34 }
 0x371   :  { %2555 = vmatprep.subr.bf16.mxu0 %v1427_v52  ;;  %v4361_v52 = vld [vmem:[#allocation44_spill] sm:$0xff] }
 0x374   :  { %2556 = vmatpush3.bf16.msra.mxu0 %v1419_v25  ;;  %v3054_v25 = vld [vmem:[#allocation8 + $0x18] sm:$0xff]  }
 0x375   :  { %2557 = vmatprep.subr.bf16.mxu0 %v1426_v10  ;;  %v4363_v10 = vld [vmem:[#allocation46_spill] sm:$0xff]  ;;  %2901 = vmatprep.subr.bf16.mxu1 %v3054_v25 }
 0x376   :  { %2902 = vmatpush3.bf16.msra.mxu1 %v3054_v25 }
 0x377   :  { %2903 = vmatprep.subr.bf16.mxu1 %v3055_v24 }
 0x378   :  { %2558 = vmatpush3.bf16.msra.mxu0 %v4338_v37  ;;  %v3057_v37 = vld [vmem:[#allocation8] sm:$0xff]  }
 0x379   :  { %2559 = vmatprep.subr.bf16.mxu0 %v1425_v40  ;;  %v4365_v40 = vld [vmem:[#allocation48_spill] sm:$0xff] }
 0x37a   :  { %2904 = vmatpush3.bf16.msra.mxu1 %v3055_v24 }
 0x37b   :  { %2905 = vmatprep.subr.bf16.mxu1 %v3056_v7 }
 0x37c   :  { %2560 = vmatpush3.bf16.msra.mxu0 %v4339_v56  ;;  %v4369_v56 = vld [vmem:[#allocation52_spill] sm:$0xff] }
 0x37d   :  { %2561 = vmatprep.subr.bf16.mxu0 %v1424_v32  ;;  %v4367_v32 = vld [vmem:[#allocation50_spill] sm:$0xff] }
 0x37e   :  { %2906 = vmatpush3.bf16.msra.mxu1 %v3056_v7  ;;  %v4378_v7 = vld [vmem:[#allocation25_spill] sm:$0xff] }
 0x37f   :  { %2907 = vmatprep.subr.bf16.mxu1 %v3057_v37 }
 0x380   :  { %2562 = vmatpush3.bf16.msra.mxu0 %v4340_v45  ;;  %v4374_v45 = vld [vmem:[#allocation57_spill] sm:$0xff] }
 0x381   :  { %2563 = vmatprep.subr.bf16.mxu0 %v1423_v50  ;;  %v4371_v50 = vld [vmem:[#allocation54_spill] sm:$0xff] }
 0x382   :  { %2908 = vmatpush3.bf16.msra.mxu1 %v3057_v37 }
 0x384   :  { %2564 = vmatpush3.bf16.msra.mxu0 %v4343_v46 }
 0x387   :  { %1464 = vmatmul.mubr.bf16.vlgmr.msra.gmra.mxu0 %v4344_v21  ;;  %v3900_v21 = vld [vmem:[%s4215_s6] ss:$0 sm:$0xff] }
 0x388   :  { %1471 = vmatprep.mubr.bf16.mxu0 %v4345_v39 }
 0x38f   :  { %1472 = vmatmul.mubr.bf16.gmra.mxu0 %v4346_v48  ;;  %v4375_v48 = vld [vmem:[#allocation28_spill] sm:$0xff] }
 0x390   :  { %1479 = vmatprep.mubr.bf16.mxu0 %v4347_v13 }
 0x397   :  { %1480 = vmatmul.mubr.bf16.gmra.mxu0 %v4348_v27 }
 0x398   :  { %1487 = vmatprep.mubr.bf16.mxu0 %v4349_v41 }
 0x39f   :  { %1488 = vmatmul.mubr.bf16.gmra.mxu0 %v4350_v53 }
 0x3a0   :  { %1495 = vmatprep.mubr.bf16.mxu0 %v3871_v8 }
 0x3a7   :  { %1496 = vmatmul.mubr.bf16.gmra.mxu0 %v4352_v55 }
 0x3a8   :  { %1503 = vmatprep.mubr.bf16.mxu0 %v4353_v43 }
 0x3af   :  { %1504 = vmatmul.mubr.bf16.gmra.mxu0 %v4354_v29  ;;  %v4376_v29 = vld [vmem:[#allocation27_spill] sm:$0xff] }
 0x3b0   :  { %1511 = vmatprep.mubr.bf16.mxu0 %v4355_v47 }
 0x3b7   :  { %1512 = vmatmul.mubr.bf16.gmra.mxu0 %v4356_v28 }
 0x3b8   :  { %1519 = vmatprep.mubr.bf16.mxu0 %v4357_v18 }
 0x3bf   :  { %1520 = vmatmul.mubr.bf16.gmra.mxu0 %v4358_v36 }
 0x3c0   :  { %1527 = vmatprep.mubr.bf16.mxu0 %v4359_v17 }
 0x3c7   :  { %1528 = vmatmul.mubr.bf16.gmra.mxu0 %v4360_v33 }
 0x3c8   :  { %1535 = vmatprep.mubr.bf16.mxu0 %v4361_v52 }
 0x3cf   :  { %1536 = vmatmul.mubr.bf16.gmra.mxu0 %v4362_v30 }
 0x3d0   :  { %1543 = vmatprep.mubr.bf16.mxu0 %v4363_v10 }
 0x3d7   :  { %1544 = vmatmul.mubr.bf16.gmra.mxu0 %v4364_v44 }
 0x3d8   :  { %1551 = vmatprep.mubr.bf16.mxu0 %v4365_v40 }
 0x3df   :  { %1552 = vmatmul.mubr.bf16.gmra.mxu0 %v4366_v22 }
 0x3e0   :  { %1559 = vmatprep.mubr.bf16.mxu0 %v4367_v32 }
 0x3e7   :  { %1560 = vmatmul.mubr.bf16.gmra.mxu0 %v4368_v49 }
 0x3e8   :  { %1567 = vmatprep.mubr.bf16.mxu0 %v4369_v56 }
 0x3ef   :  { %1568 = vmatmul.mubr.bf16.gmra.mxu0 %v4370_v31  ;;  %v4379_v31 = vld [vmem:[#allocation22_spill] sm:$0xff] }
 0x3f0   :  { %1575 = vmatprep.mubr.bf16.mxu0 %v4371_v50 }
 0x3f7   :  { %1576 = vmatmul.mubr.bf16.gmra.mxu0 %v4372_v42 }
 0x3f8   :  { %1583 = vmatprep.mubr.bf16.mxu0 %v4373_v38 }
 0x3ff   :  { %1584 = vmatmul.mubr.bf16.gmra.mxu0 %v4374_v45 }
 0x447   :  { %v2565_v14 = vpop.f32.mrf.mxu0 }
 0x449   :  { %v2566_v26 = vpop.f32.mrf.mxu0 }
 0x44a   :  { %v2567_v46 = vadd.f32 %v2566_v26, %v2565_v14 }
 0x44b   :  { %v2568_v39 = vpop.f32.mrf.mxu0 }
 0x44c   :  { %v1592_v13 = vmul.f32 %v2567_v46, %v4375_v48 }
 0x44d   :  { %v2569_v27 = vpop.f32.mrf.mxu0 }
 0x44e   :  { %v1630_v41 = vadd.f32 %v3900_v21, %v1592_v13  ;;  %v2570_v53 = vadd.f32 %v2569_v27, %v2568_v39  ;;  %v4380_v39 = vld [vmem:[#allocation23_spill] sm:$0xff] }
 0x44f   :  { %v2571_v55 = vpop.f32.mrf.mxu0 }
 0x450   :  { %v1662_v43 = vmax.f32 %v1630_v41, 0.0  ;;  %v1593_v47 = vmul.f32 %v2570_v53, %v4376_v29 }
 0x451   :  { %v2572_v28 = vpop.f32.mrf.mxu0 }
 0x452   :  { %2247 = vst [vmem:[#allocation11] sm:$0xff] %v1662_v43  ;;  %v1631_v18 = vadd.f32 %v3900_v21, %v1593_v47  ;;  %v2573_v36 = vadd.f32 %v2572_v28, %v2571_v55  ;;  %v4381_v47 = vld [vmem:[#allocation20_spill] sm:$0xff] }
 0x453   :  { %v2574_v17 = vpop.f32.mrf.mxu0 }
 0x454   :  { %v1663_v33 = vmax.f32 %v1631_v18, 0.0  ;;  %v1594_v52 = vmul.f32 %v2573_v36, %v4377_v35 }
 0x455   :  { %v2575_v34 = vpop.f32.mrf.mxu0 }
 0x456   :  { %2248 = vst [vmem:[#allocation11 + $0x8] sm:$0xff] %v1663_v33  ;;  %v1632_v30 = vadd.f32 %v3900_v21, %v1594_v52  ;;  %v2576_v25 = vadd.f32 %v2575_v34, %v2574_v17  ;;  %v1694_v10 = vpack.c.bf16 %v1663_v33, %v1662_v43 }
 0x457   :  { %v2577_v24 = vpop.f32.mrf.mxu0 }
 0x458   :  { %v1664_v44 = vmax.f32 %v1632_v30, 0.0  ;;  %v1595_v40 = vmul.f32 %v2576_v25, %v4378_v7  ;;  %2909 = vmatprep.mubr.bf16.mxu1 %v1694_v10  ;;  %v4382_v30 = vld [vmem:[#allocation21_spill] sm:$0xff] }
 0x459   :  { %v2578_v37 = vpop.f32.mrf.mxu0 }
 0x45a   :  { %2249 = vst [vmem:[#allocation11 + $0x10] sm:$0xff] %v1664_v44  ;;  %v1633_v22 = vadd.f32 %v3900_v21, %v1595_v40  ;;  %v2579_v32 = vadd.f32 %v2578_v37, %v2577_v24 }
 0x45b   :  { %v2580_v49 = vpop.f32.mrf.mxu0 }
 0x45c   :  { %v1665_v56 = vmax.f32 %v1633_v22, 0.0  ;;  %v1596_v50 = vmul.f32 %v2579_v32, %v4379_v31 }
 0x45d   :  { %v2581_v42 = vpop.f32.mrf.mxu0 }
 0x45e   :  { %v1695_v38 = vpack.c.bf16 %v1665_v56, %v1664_v44  ;;  %2250 = vst [vmem:[#allocation11 + $0x18] sm:$0xff] %v1665_v56  ;;  %v1634_v45 = vadd.f32 %v3900_v21, %v1596_v50  ;;  %v2582_v14 = vadd.f32 %v2581_v42, %v2580_v49 }
 0x45f   :  { %v2583_v26 = vpop.f32.mrf.mxu0 }
 0x460   :  { %v1666_v46 = vmax.f32 %v1634_v45, 0.0  ;;  %v1597_v13 = vmul.f32 %v2582_v14, %v4380_v39  ;;  %2910 = vmatmul.mubr.bf16.vlgmr.msra.gmra.mxu1 %v1695_v38 }
 0x461   :  { %v2584_v27 = vpop.f32.mrf.mxu0 }
 0x462   :  { %2251 = vst [vmem:[#allocation11 + $0x20] sm:$0xff] %v1666_v46  ;;  %v1635_v41 = vadd.f32 %v3900_v21, %v1597_v13  ;;  %v2585_v53 = vadd.f32 %v2584_v27, %v2583_v26 }
 0x463   :  { %v2586_v55 = vpop.f32.mrf.mxu0 }
 0x464   :  { %v1667_v43 = vmax.f32 %v1635_v41, 0.0  ;;  %v1598_v28 = vmul.f32 %v2585_v53, %v4381_v47 }
 0x465   :  { %v2587_v18 = vpop.f32.mrf.mxu0 }
 0x466   :  { %2252 = vst [vmem:[#allocation11 + $0x28] sm:$0xff] %v1667_v43  ;;  %v1636_v36 = vadd.f32 %v3900_v21, %v1598_v28  ;;  %v2588_v17 = vadd.f32 %v2587_v18, %v2586_v55  ;;  %v1696_v33 = vpack.c.bf16 %v1667_v43, %v1666_v46 }
 0x467   :  { %v2589_v52 = vpop.f32.mrf.mxu0 }
 0x468   :  { %v1668_v34 = vmax.f32 %v1636_v36, 0.0  ;;  %v1599_v25 = vmul.f32 %v2588_v17, %v4382_v30  ;;  %2913 = vmatprep.mubr.bf16.mxu1 %v1696_v33 }
 0x469   :  { %v2590_v10 = vpop.f32.mrf.mxu0 }
 0x46a   :  { %2253 = vst [vmem:[#allocation11 + $0x30] sm:$0xff] %v1668_v34  ;;  %v1637_v24 = vadd.f32 %v3900_v21, %v1599_v25  ;;  %v2591_v44 = vadd.f32 %v2590_v10, %v2589_v52 }
 0x46b   :  { %v2592_v40 = vpop.f32.mrf.mxu0 }
 0x46c   :  { %v1669_v37 = vmax.f32 %v1637_v24, 0.0  ;;  %v1600_v22 = vmul.f32 %v2591_v44, %v3442_v9 }
 0x46d   :  { %v2593_v32 = vpop.f32.mrf.mxu0 }
 0x46e   :  { %2254 = vst [vmem:[#allocation11 + $0x38] sm:$0xff] %v1669_v37  ;;  %v1638_v49 = vadd.f32 %v3900_v21, %v1600_v22  ;;  %v2594_v56 = vadd.f32 %v2593_v32, %v2592_v40  ;;  %v1697_v50 = vpack.c.bf16 %v1669_v37, %v1668_v34 }
 0x46f   :  { %v2595_v42 = vpop.f32.mrf.mxu0 }
 0x470   :  { %v1670_v38 = vmax.f32 %v1638_v49, 0.0  ;;  %v1601_v45 = vmul.f32 %v2594_v56, %v4337_v23  ;;  %2914 = vmatmul.mubr.bf16.gmra.mxu1 %v1697_v50 }
 0x471   :  { %v2596_v14 = vpop.f32.mrf.mxu0 }
 0x472   :  { %2255 = vst [vmem:[#allocation11 + $0x40] sm:$0xff] %v1670_v38  ;;  %v1639_v26 = vadd.f32 %v3900_v21, %v1601_v45  ;;  %v2597_v46 = vadd.f32 %v2596_v14, %v2595_v42 }
 0x473   :  { %v2598_v13 = vpop.f32.mrf.mxu0 }
 0x474   :  { %v1671_v27 = vmax.f32 %v1639_v26, 0.0  ;;  %v1602_v41 = vmul.f32 %v2597_v46, %v3426_v3 }
 0x475   :  { %v2599_v53 = vpop.f32.mrf.mxu0 }
 0x476   :  { %2256 = vst [vmem:[#allocation11 + $0x48] sm:$0xff] %v1671_v27  ;;  %v1640_v55 = vadd.f32 %v3900_v21, %v1602_v41  ;;  %v2600_v43 = vadd.f32 %v2599_v53, %v2598_v13  ;;  %v1698_v28 = vpack.c.bf16 %v1671_v27, %v1670_v38 }
 0x477   :  { %v2601_v18 = vpop.f32.mrf.mxu0 }
 0x478   :  { %v1672_v36 = vmax.f32 %v1640_v55, 0.0  ;;  %v1603_v17 = vmul.f32 %v2600_v43, %v3428_v4  ;;  %2917 = vmatprep.mubr.bf16.mxu1 %v1698_v28 }
 0x479   :  { %v2602_v33 = vpop.f32.mrf.mxu0 }
 0x47a   :  { %2257 = vst [vmem:[#allocation11 + $0x50] sm:$0xff] %v1672_v36  ;;  %v1641_v52 = vadd.f32 %v3900_v21, %v1603_v17  ;;  %v2603_v34 = vadd.f32 %v2602_v33, %v2601_v18 }
 0x47b   :  { %v2604_v25 = vpop.f32.mrf.mxu0 }
 0x47c   :  { %v1673_v10 = vmax.f32 %v1641_v52, 0.0  ;;  %v1604_v24 = vmul.f32 %v2603_v34, %v3418_v63 }
 0x47d   :  { %v2605_v44 = vpop.f32.mrf.mxu0 }
 0x47e   :  { %2258 = vst [vmem:[#allocation11 + $0x58] sm:$0xff] %v1673_v10  ;;  %v1642_v40 = vadd.f32 %v3900_v21, %v1604_v24  ;;  %v2606_v37 = vadd.f32 %v2605_v44, %v2604_v25  ;;  %v1699_v22 = vpack.c.bf16 %v1673_v10, %v1672_v36 }
 0x47f   :  { %v2607_v32 = vpop.f32.mrf.mxu0 }
 0x480   :  { %v1674_v49 = vmax.f32 %v1642_v40, 0.0  ;;  %v1605_v56 = vmul.f32 %v2606_v37, %v3420_v0  ;;  %2918 = vmatmul.mubr.bf16.gmra.mxu1 %v1699_v22 }
 0x481   :  { %v2608_v50 = vpop.f32.mrf.mxu0 }
 0x482   :  { %2259 = vst [vmem:[#allocation11 + $0x60] sm:$0xff] %v1674_v49  ;;  %v1643_v42 = vadd.f32 %v3900_v21, %v1605_v56  ;;  %v2609_v38 = vadd.f32 %v2608_v50, %v2607_v32 }
 0x483   :  { %v2610_v45 = vpop.f32.mrf.mxu0 }
 0x484   :  { %v1675_v14 = vmax.f32 %v1643_v42, 0.0  ;;  %v1606_v26 = vmul.f32 %v2609_v38, %v3408_v58 }
 0x485   :  { %v2611_v46 = vpop.f32.mrf.mxu0 }
 0x486   :  { %2260 = vst [vmem:[#allocation11 + $0x68] sm:$0xff] %v1675_v14  ;;  %v1644_v13 = vadd.f32 %v3900_v21, %v1606_v26  ;;  %v2612_v27 = vadd.f32 %v2611_v46, %v2610_v45  ;;  %v1700_v41 = vpack.c.bf16 %v1675_v14, %v1674_v49 }
 0x487   :  { %v2613_v53 = vpop.f32.mrf.mxu0 }
 0x488   :  { %v1676_v55 = vmax.f32 %v1644_v13, 0.0  ;;  %v1607_v43 = vmul.f32 %v2612_v27, %v3412_v60  ;;  %2921 = vmatprep.mubr.bf16.mxu1 %v1700_v41 }
 0x489   :  { %v2614_v28 = vpop.f32.mrf.mxu0 }
 0x48a   :  { %2261 = vst [vmem:[#allocation11 + $0x70] sm:$0xff] %v1676_v55  ;;  %v1645_v18 = vadd.f32 %v3900_v21, %v1607_v43  ;;  %v2615_v36 = vadd.f32 %v2614_v28, %v2613_v53 }
 0x48b   :  { %v2616_v17 = vpop.f32.mrf.mxu0 }
 0x48c   :  { %v1677_v33 = vmax.f32 %v1645_v18, 0.0  ;;  %v1608_v52 = vmul.f32 %v2615_v36, %v3519_v51 }
 0x48d   :  { %v2617_v34 = vpop.f32.mrf.mxu0 }
 0x48e   :  { %2262 = vst [vmem:[#allocation11 + $0x78] sm:$0xff] %v1677_v33  ;;  %v1646_v25 = vadd.f32 %v3900_v21, %v1608_v52  ;;  %v2618_v10 = vadd.f32 %v2617_v34, %v2616_v17  ;;  %v1701_v24 = vpack.c.bf16 %v1677_v33, %v1676_v55 }
 0x48f   :  { %v2619_v44 = vpop.f32.mrf.mxu0 }
 0x490   :  { %v1678_v40 = vmax.f32 %v1646_v25, 0.0  ;;  %v1609_v37 = vmul.f32 %v2618_v10, %v3514_v54  ;;  %2922 = vmatmul.mubr.bf16.gmra.mxu1 %v1701_v24 }
 0x491   :  { %v2620_v22 = vpop.f32.mrf.mxu0 }
 0x492   :  { %2263 = vst [vmem:[#allocation11 + $0x80] sm:$0xff] %v1678_v40  ;;  %v1647_v32 = vadd.f32 %v3900_v21, %v1609_v37  ;;  %v2621_v49 = vadd.f32 %v2620_v22, %v2619_v44 }
 0x493   :  { %v2622_v56 = vpop.f32.mrf.mxu0 }
 0x494   :  { %v1679_v50 = vmax.f32 %v1647_v32, 0.0  ;;  %v1610_v42 = vmul.f32 %v2621_v49, %v3463_v19 }
 0x495   :  { %v2623_v38 = vpop.f32.mrf.mxu0 }
 0x496   :  { %2264 = vst [vmem:[#allocation11 + $0x88] sm:$0xff] %v1679_v50  ;;  %v1648_v45 = vadd.f32 %v3900_v21, %v1610_v42  ;;  %v2624_v14 = vadd.f32 %v2623_v38, %v2622_v56  ;;  %v1702_v26 = vpack.c.bf16 %v1679_v50, %v1678_v40 }
 0x497   :  { %v2625_v46 = vpop.f32.mrf.mxu0 }
 0x498   :  { %v1680_v13 = vmax.f32 %v1648_v45, 0.0  ;;  %v1611_v27 = vmul.f32 %v2624_v14, %v3465_v20  ;;  %2925 = vmatprep.mubr.bf16.mxu1 %v1702_v26 }
 0x499   :  { %v2626_v41 = vpop.f32.mrf.mxu0 }
 0x49a   :  { %2265 = vst [vmem:[#allocation11 + $0x90] sm:$0xff] %v1680_v13  ;;  %v1649_v53 = vadd.f32 %v3900_v21, %v1611_v27  ;;  %v2627_v55 = vadd.f32 %v2626_v41, %v2625_v46 }
 0x49b   :  { %v2628_v43 = vpop.f32.mrf.mxu0 }
 0x49c   :  { %v1681_v28 = vmax.f32 %v1649_v53, 0.0  ;;  %v1612_v18 = vmul.f32 %v2627_v55, %v3455_v15 }
 0x49d   :  { %v2629_v36 = vpop.f32.mrf.mxu0 }
 0x49e   :  { %2266 = vst [vmem:[#allocation11 + $0x98] sm:$0xff] %v1681_v28  ;;  %v1650_v17 = vadd.f32 %v3900_v21, %v1612_v18  ;;  %v2630_v33 = vadd.f32 %v2629_v36, %v2628_v43  ;;  %v1703_v52 = vpack.c.bf16 %v1681_v28, %v1680_v13 }
 0x49f   :  { %v2631_v34 = vpop.f32.mrf.mxu0 }
 0x4a0   :  { %v1682_v25 = vmax.f32 %v1650_v17, 0.0  ;;  %v1613_v10 = vmul.f32 %v2630_v33, %v3457_v16  ;;  %2926 = vmatmul.mubr.bf16.gmra.mxu1 %v1703_v52 }
 0x4a1   :  { %v2632_v24 = vpop.f32.mrf.mxu0 }
 0x4a2   :  { %2267 = vst [vmem:[#allocation11 + $0xa0] sm:$0xff] %v1682_v25  ;;  %v1651_v44 = vadd.f32 %v3900_v21, %v1613_v10  ;;  %v2633_v40 = vadd.f32 %v2632_v24, %v2631_v34 }
 0x4a3   :  { %v2634_v37 = vpop.f32.mrf.mxu0 }
 0x4a4   :  { %v1683_v22 = vmax.f32 %v1651_v44, 0.0  ;;  %v1614_v32 = vmul.f32 %v2633_v40, %v3447_v11 }
 0x4a5   :  { %v2635_v49 = vpop.f32.mrf.mxu0 }
 0x4a6   :  { %2268 = vst [vmem:[#allocation11 + $0xa8] sm:$0xff] %v1683_v22  ;;  %v1652_v56 = vadd.f32 %v3900_v21, %v1614_v32  ;;  %v2636_v50 = vadd.f32 %v2635_v49, %v2634_v37  ;;  %v1704_v42 = vpack.c.bf16 %v1683_v22, %v1682_v25 }
 0x4a7   :  { %v2637_v38 = vpop.f32.mrf.mxu0 }
 0x4a8   :  { %v1684_v45 = vmax.f32 %v1652_v56, 0.0  ;;  %v1615_v14 = vmul.f32 %v2636_v50, %v3449_v12  ;;  %2929 = vmatprep.mubr.bf16.mxu1 %v1704_v42 }
 0x4a9   :  { %v2638_v26 = vpop.f32.mrf.mxu0 }
 0x4aa   :  { %2269 = vst [vmem:[#allocation11 + $0xb0] sm:$0xff] %v1684_v45  ;;  %v1653_v46 = vadd.f32 %v3900_v21, %v1615_v14  ;;  %v2639_v13 = vadd.f32 %v2638_v26, %v2637_v38 }
 0x4ab   :  { %v2640_v27 = vpop.f32.mrf.mxu0 }
 0x4ac   :  { %v1685_v41 = vmax.f32 %v1653_v46, 0.0  ;;  %v1616_v53 = vmul.f32 %v2639_v13, %v3430_v5 }
 0x4ad   :  { %v2641_v55 = vpop.f32.mrf.mxu0 }
 0x4ae   :  { %2270 = vst [vmem:[#allocation11 + $0xb8] sm:$0xff] %v1685_v41  ;;  %v1654_v43 = vadd.f32 %v3900_v21, %v1616_v53  ;;  %v2642_v28 = vadd.f32 %v2641_v55, %v2640_v27  ;;  %v1705_v18 = vpack.c.bf16 %v1685_v41, %v1684_v45 }
 0x4af   :  { %v2643_v36 = vpop.f32.mrf.mxu0 }
 0x4b0   :  { %v1686_v17 = vmax.f32 %v1654_v43, 0.0  ;;  %v1617_v33 = vmul.f32 %v2642_v28, %v3432_v6  ;;  %2930 = vmatmul.mubr.bf16.gmra.mxu1 %v1705_v18 }
 0x4b1   :  { %v2644_v52 = vpop.f32.mrf.mxu0 }
 0x4b2   :  { %2271 = vst [vmem:[#allocation11 + $0xc0] sm:$0xff] %v1686_v17  ;;  %v1655_v34 = vadd.f32 %v3900_v21, %v1617_v33  ;;  %v2645_v25 = vadd.f32 %v2644_v52, %v2643_v36 }
 0x4b3   :  { %v2646_v10 = vpop.f32.mrf.mxu0 }
 0x4b4   :  { %v1687_v24 = vmax.f32 %v1655_v34, 0.0  ;;  %v1618_v44 = vmul.f32 %v2645_v25, %v3422_v1 }
 0x4b5   :  { %v2647_v40 = vpop.f32.mrf.mxu0 }
 0x4b6   :  { %2272 = vst [vmem:[#allocation11 + $0xc8] sm:$0xff] %v1687_v24  ;;  %v1656_v37 = vadd.f32 %v3900_v21, %v1618_v44  ;;  %v2648_v22 = vadd.f32 %v2647_v40, %v2646_v10  ;;  %v1706_v32 = vpack.c.bf16 %v1687_v24, %v1686_v17 }
 0x4b7   :  { %v2649_v49 = vpop.f32.mrf.mxu0 }
 0x4b8   :  { %v1688_v56 = vmax.f32 %v1656_v37, 0.0  ;;  %v1619_v50 = vmul.f32 %v2648_v22, %v3424_v2  ;;  %2933 = vmatprep.mubr.bf16.mxu1 %v1706_v32 }
 0x4b9   :  { %v2650_v42 = vpop.f32.mrf.mxu0 }
 0x4ba   :  { %2273 = vst [vmem:[#allocation11 + $0xd0] sm:$0xff] %v1688_v56  ;;  %v1657_v38 = vadd.f32 %v3900_v21, %v1619_v50  ;;  %v2651_v45 = vadd.f32 %v2650_v42, %v2649_v49 }
 0x4bb   :  { %v2652_v14 = vpop.f32.mrf.mxu0 }
 0x4bc   :  { %v1689_v26 = vmax.f32 %v1657_v38, 0.0  ;;  %v1620_v46 = vmul.f32 %v2651_v45, %v3414_v61 }
 0x4bd   :  { %v2653_v13 = vpop.f32.mrf.mxu0 }
 0x4be   :  { %2274 = vst [vmem:[#allocation11 + $0xd8] sm:$0xff] %v1689_v26  ;;  %v1658_v27 = vadd.f32 %v3900_v21, %v1620_v46  ;;  %v2654_v41 = vadd.f32 %v2653_v13, %v2652_v14  ;;  %v1707_v53 = vpack.c.bf16 %v1689_v26, %v1688_v56  ;;  %v3059_v56 = vld [vmem:[%s4209_s0 + $0x4] ss:$8 sps:$4 sm:$0xff]  }
 0x4bf   :  { %v2655_v55 = vpop.f32.mrf.mxu0 }
 0x4c0   :  { %v1690_v43 = vmax.f32 %v1658_v27, 0.0  ;;  %v1621_v28 = vmul.f32 %v2654_v41, %v3416_v62  ;;  %2934 = vmatmul.mubr.bf16.gmra.mxu1 %v1707_v53 }
 0x4c1   :  { %v2656_v18 = vpop.f32.mrf.mxu0 }
 0x4c2   :  { %2275 = vst [vmem:[#allocation11 + $0xe0] sm:$0xff] %v1690_v43  ;;  %v1659_v36 = vadd.f32 %v3900_v21, %v1621_v28  ;;  %v2657_v17 = vadd.f32 %v2656_v18, %v2655_v55 }
 0x4c3   :  { %v2658_v33 = vpop.f32.mrf.mxu0 }
 0x4c4   :  { %v1691_v52 = vmax.f32 %v1659_v36, 0.0  ;;  %v1622_v34 = vmul.f32 %v2657_v17, %v3406_v57 }
 0x4c5   :  { %v2659_v25 = vpop.f32.mrf.mxu0 }
 0x4c6   :  { %2276 = vst [vmem:[#allocation11 + $0xe8] sm:$0xff] %v1691_v52  ;;  %v1660_v10 = vadd.f32 %v3900_v21, %v1622_v34  ;;  %v2660_v24 = vadd.f32 %v2659_v25, %v2658_v33  ;;  %v1708_v44 = vpack.c.bf16 %v1691_v52, %v1690_v43 }
 0x4c8   :  { %v1692_v40 = vmax.f32 %v1660_v10, 0.0  ;;  %v1623_v37 = vmul.f32 %v2660_v24, %v3410_v59  ;;  %2937 = vmatprep.mubr.bf16.mxu1 %v1708_v44 }
 0x4ca   :  { %2277 = vst [vmem:[#allocation11 + $0xf0] sm:$0xff] %v1692_v40  ;;  %v1661_v22 = vadd.f32 %v3900_v21, %v1623_v37 }
 0x4cc   :  { %v1693_v32 = vmax.f32 %v1661_v22, 0.0 }
 0x4ce   :  { %2278 = vst [vmem:[#allocation11 + $0xf8] sm:$0xff] %v1693_v32  ;;  %v1709_v49 = vpack.c.bf16 %v1693_v32, %v1692_v40 }
 0x4d0   :  { %2938 = vmatmul.mubr.bf16.gmra.mxu1 %v1709_v49 }
 0x4d1   :  { %2016 = vmatprep.mubr.bf16.mxu1 %v3059_v56 }
 0x520   :  { %v2911_v50 = vpop.f32.mrf.mxu1 }
 0x521   :  { %v3970_v45 = vmul.f32 %v2911_v50, %v4377_v35 }
 0x522   :  { %v1809_v42 = vpop.f32.mrf.mxu1 }
 0x523   :  { %4383 = vst [vmem:[#allocation58_spill] sm:$0xff] %v3970_v45  ;;  %v3976_v21 = vmul.f32 %v1809_v42, %v4375_v48 }
 0x524   :  { %v2912_v38 = vpop.f32.mrf.mxu1 }
 0x525   :  { %v3973_v14 = vmul.f32 %v2912_v38, %v4378_v7  ;;  %4384 = vst [vmem:[#allocation18_spill] sm:$0xff] %v3976_v21 }
 0x526   :  { %v1812_v26 = vpop.f32.mrf.mxu1 }
 0x527   :  { %v3981_v13 = vmul.f32 %v1812_v26, %v4376_v29 }
 0x529   :  { %4385 = vst [vmem:[#allocation26_spill] sm:$0xff] %v3981_v13 }
 0x530   :  { %v2915_v41 = vpop.f32.mrf.mxu1 }
 0x531   :  { %v3986_v43 = vmul.f32 %v2915_v41, %v4381_v47 }
 0x532   :  { %v1825_v53 = vpop.f32.mrf.mxu1 }
 0x533   :  { %v3992_v36 = vmul.f32 %v1825_v53, %v4379_v31 }
 0x534   :  { %v2916_v55 = vpop.f32.mrf.mxu1 }
 0x535   :  { %v3989_v28 = vmul.f32 %v2916_v55, %v4382_v30 }
 0x536   :  { %v1828_v18 = vpop.f32.mrf.mxu1 }
 0x537   :  { %v3997_v33 = vmul.f32 %v1828_v18, %v4380_v39 }
 0x540   :  { %v2919_v34 = vpop.f32.mrf.mxu1 }
 0x542   :  { %v1841_v25 = vpop.f32.mrf.mxu1 }
 0x544   :  { %v2920_v10 = vpop.f32.mrf.mxu1 }
 0x546   :  { %v1844_v24 = vpop.f32.mrf.mxu1 }
 0x550   :  { %v2923_v44 = vpop.f32.mrf.mxu1 }
 0x551   :  { %v1950_v31 = vmul.f32 %v2923_v44, %v3408_v58 }
 0x552   :  { %v1857_v40 = vpop.f32.mrf.mxu1 }
 0x554   :  { %v2924_v37 = vpop.f32.mrf.mxu1 }
 0x555   :  { %v1951_v17 = vmul.f32 %v2924_v37, %v3412_v60  ;;  %v1948_v37 = vmul.f32 %v1857_v40, %v3418_v63 }
 0x556   :  { %v1860_v22 = vpop.f32.mrf.mxu1 }
 0x557   :  { %v1975_v8 = vpack.c.bf16 %v1951_v17, %v1950_v31  ;;  %v1949_v21 = vmul.f32 %v1860_v22, %v3420_v0 }
 0x559   :  { %v1974_v44 = vpack.c.bf16 %v1949_v21, %v1948_v37  ;;  %v3067_v37 = vld [vmem:[%s4209_s0 + $0x40] ss:$8 sps:$4 sm:$0xff]  }
 0x560   :  { %v2927_v32 = vpop.f32.mrf.mxu1 }
 0x562   :  { %v1873_v49 = vpop.f32.mrf.mxu1 }
 0x564   :  { %v2928_v56 = vpop.f32.mrf.mxu1 }
 0x566   :  { %v1876_v50 = vpop.f32.mrf.mxu1 }
 0x567   :  { %v1953_v22 = vmul.f32 %v1876_v50, %v3514_v54  ;;  %v3060_v50 = vld [vmem:[%s4209_s0] ss:$8 sps:$4 sm:$0xff]  }
 0x570   :  { %v2931_v42 = vpop.f32.mrf.mxu1 }
 0x572   :  { %v1889_v38 = vpop.f32.mrf.mxu1 }
 0x573   :  { %v1956_v17 = vmul.f32 %v1889_v38, %v3455_v15  ;;  %v1952_v38 = vmul.f32 %v1873_v49, %v3519_v51  ;;  %v3064_v49 = vld [vmem:[%s4209_s0 + $0x20] ss:$8 sps:$4 sm:$0xff]  }
 0x574   :  { %v2932_v26 = vpop.f32.mrf.mxu1 }
 0x576   :  { %v1892_v41 = vpop.f32.mrf.mxu1 }
 0x580   :  { %v2935_v53 = vpop.f32.mrf.mxu1 }
 0x582   :  { %v1905_v55 = vpop.f32.mrf.mxu1 }
 0x583   :  { %v1960_v31 = vmul.f32 %v1905_v55, %v3430_v5  ;;  %v3066_v55 = vld [vmem:[%s4209_s0 + $0x30] ss:$8 sps:$4 sm:$0xff]  }
 0x584   :  { %v2936_v18 = vpop.f32.mrf.mxu1 }
 0x585   :  { %v1963_v13 = vmul.f32 %v2936_v18, %v3424_v2  ;;  %v4393_v18 = vld [vmem:[#allocation19_spill] sm:$0xff] }
 0x586   :  { %v1908_v27 = vpop.f32.mrf.mxu1 }
 0x590   :  { %v2939_v46 = vpop.f32.mrf.mxu1 }
 0x591   :  { %v1966_v47 = vmul.f32 %v2939_v46, %v3406_v57  ;;  %v1947_v46 = vmul.f32 %v2920_v10, %v3428_v4 }
 0x592   :  { %v1921_v52 = vpop.f32.mrf.mxu1 }
 0x593   :  { %v1964_v35 = vmul.f32 %v1921_v52, %v3414_v61 }
 0x594   :  { %v2940_v30 = vpop.f32.mrf.mxu1 }
 0x595   :  { %v1967_v39 = vmul.f32 %v2940_v30, %v3410_v59  ;;  %v1962_v30 = vmul.f32 %v2935_v53, %v3422_v1  ;;  %v3065_v53 = vld [vmem:[%s4209_s0 + $0x34] ss:$8 sps:$4 sm:$0xff]  }
 0x596   :  { %v1924_v7 = vpop.f32.mrf.mxu1 }
 0x597   :  { %v1983_v29 = vpack.c.bf16 %v1967_v39, %v1966_v47  ;;  %v1965_v48 = vmul.f32 %v1924_v7, %v3416_v62  ;;  %v1981_v52 = vpack.c.bf16 %v1963_v13, %v1962_v30  ;;  %v1961_v39 = vmul.f32 %v1908_v27, %v3432_v6  ;;  %v3068_v30 = vld [vmem:[%s4209_s0 + $0x54] ss:$8 sps:$4 sm:$0xff]  }
 0x598   :  { %v1946_v7 = vmul.f32 %v2919_v34, %v3426_v3  ;;  %v1944_v47 = vmul.f32 %v1841_v25, %v3442_v9  ;;  %v1957_v27 = vmul.f32 %v1892_v41, %v3457_v16  ;;  %v1955_v34 = vmul.f32 %v2928_v56, %v3465_v20  ;;  %v4388_v56 = vld [vmem:[#allocation58_spill] sm:$0xff] }
 0x599   :  { %v1982_v45 = vpack.c.bf16 %v1965_v48, %v1964_v35  ;;  %2685 = vmatprep.subr.bf16.mxu1 %v1983_v29  ;;  %v1945_v29 = vmul.f32 %v1844_v24, %v4337_v23  ;;  %v1980_v35 = vpack.c.bf16 %v1961_v39, %v1960_v31  ;;  %v4386_v24 = vpack.c.bf16 %v3989_v28, %v3986_v43  ;;  %v4390_v43 = vld [vmem:[#allocation26_spill] sm:$0xff]  ;;  %v3072_v39 = vld [vmem:[%s4209_s0 + $0x74] ss:$8 sps:$4 sm:$0xff]  }
 0x59a   :  { %2686 = vmatpush3.bf16.msra.mxu1 %v1975_v8  ;;  %v1973_v48 = vpack.c.bf16 %v1947_v46, %v1946_v7  ;;  %v1959_v8 = vmul.f32 %v2932_v26, %v3449_v12  ;;  %v1978_v10 = vpack.c.bf16 %v1957_v27, %v1956_v17  ;;  %v1954_v25 = vmul.f32 %v2927_v32, %v3463_v19  ;;  %v4391_v28 = vld [vmem:[#allocation18_spill] sm:$0xff]  ;;  %v3069_v46 = vld [vmem:[%s4209_s0 + $0x50] ss:$8 sps:$4 sm:$0xff]   ;;  %v3084_v17 = vld [vmem:[%s4209_s0 + $0xd4] ss:$8 sps:$4 sm:$0xff]  }
 0x59b   :  { %2687 = vmatprep.subr.bf16.mxu1 %v1982_v45  ;;  %v1958_v45 = vmul.f32 %v2931_v42, %v3447_v11  ;;  %v1972_v21 = vpack.c.bf16 %v1945_v29, %v1944_v47  ;;  %v4387_v42 = vpack.c.bf16 %v3997_v33, %v3992_v36  ;;  %v1976_v26 = vpack.c.bf16 %v1953_v22, %v1952_v38  ;;  %v3061_v36 = vld [vmem:[%s4209_s0 + $0x14] ss:$8 sps:$4 sm:$0xff]   ;;  %v3063_v33 = vld [vmem:[%s4209_s0 + $0x24] ss:$8 sps:$4 sm:$0xff]   ;;  %v3073_v7 = vld [vmem:[%s4209_s0 + $0x70] ss:$8 sps:$4 sm:$0xff]  }
 0x59c   :  { %v1977_v40 = vpack.c.bf16 %v1955_v34, %v1954_v25  ;;  %v4389_v41 = vpack.c.bf16 %v3973_v14, %v4388_v56  ;;  %v4392_v32 = vpack.c.bf16 %v4390_v43, %v4391_v28  ;;  %v3062_v14 = vld [vmem:[%s4209_s0 + $0x10] ss:$8 sps:$4 sm:$0xff]   ;;  %v3074_v31 = vld [vmem:[%s4209_s0 + $0x84] ss:$8 sps:$4 sm:$0xff]   ;;  %v3076_v29 = vld [vmem:[%s4209_s0 + $0x94] ss:$8 sps:$4 sm:$0xff]  }
 0x59d   :  { %v1979_v13 = vpack.c.bf16 %v1959_v8, %v1958_v45  ;;  %v3077_v8 = vld [vmem:[%s4209_s0 + $0x90] ss:$8 sps:$4 sm:$0xff]   ;;  %v3079_v47 = vld [vmem:[%s4209_s0 + $0xa0] ss:$8 sps:$4 sm:$0xff]   ;;  %v3080_v45 = vld [vmem:[%s4209_s0 + $0xb4] ss:$8 sps:$4 sm:$0xff]  }
 0x59e   :  { %2688 = vmatpush3.bf16.msra.mxu1 %v1974_v44  ;;  %v3070_v44 = vld [vmem:[%s4209_s0 + $0x64] ss:$8 sps:$4 sm:$0xff]   ;;  %v3083_v27 = vld [vmem:[%s4209_s0 + $0xc0] ss:$8 sps:$4 sm:$0xff]   ;;  %v3085_v34 = vld [vmem:[%s4209_s0 + $0xd0] ss:$8 sps:$4 sm:$0xff]  }
 0x59f   :  { %2689 = vmatprep.subr.bf16.mxu1 %v1981_v52  ;;  %v3071_v52 = vld [vmem:[%s4209_s0 + $0x60] ss:$8 sps:$4 sm:$0xff]   ;;  %v3088_v25 = vld [vmem:[%s4209_s0 + $0xf4] ss:$8 sps:$4 sm:$0xff]  }
 0x5a2   :  { %2690 = vmatpush3.bf16.msra.mxu1 %v1973_v48  ;;  %v3075_v48 = vld [vmem:[%s4209_s0 + $0x80] ss:$8 sps:$4 sm:$0xff]  }
 0x5a3   :  { %2691 = vmatprep.subr.bf16.mxu1 %v1980_v35  ;;  %v3078_v35 = vld [vmem:[%s4209_s0 + $0xa4] ss:$8 sps:$4 sm:$0xff]  }
 0x5a6   :  { %2692 = vmatpush3.bf16.msra.mxu1 %v1972_v21  ;;  %v3081_v21 = vld [vmem:[%s4209_s0 + $0xb0] ss:$8 sps:$4 sm:$0xff]  }
 0x5a7   :  { %2693 = vmatprep.subr.bf16.mxu1 %v1979_v13  ;;  %v3082_v13 = vld [vmem:[%s4209_s0 + $0xc4] ss:$8 sps:$4 sm:$0xff]  }
 0x5aa   :  { %2694 = vmatpush3.bf16.msra.mxu1 %v4386_v24  ;;  %v3087_v24 = vld [vmem:[%s4209_s0 + $0xe0] ss:$8 sps:$4 sm:$0xff]  }
 0x5ab   :  { %2695 = vmatprep.subr.bf16.mxu1 %v1978_v10  ;;  %v3086_v10 = vld [vmem:[%s4209_s0 + $0xe4] ss:$8 sps:$4 sm:$0xff]  }
 0x5ae   :  { %2696 = vmatpush3.bf16.msra.mxu1 %v4387_v42 }
 0x5af   :  { %2697 = vmatprep.subr.bf16.mxu1 %v1977_v40  ;;  %v3089_v40 = vld [vmem:[%s4209_s0 + $0xf0] ss:$8 sps:$4 sm:$0xff]   ;;  %s3170_s0 = scalar_lea.vmem %s2297_s29, 4096 }
 0x5b0   :  { %p3171_p6 = scmp.ne.s32.totalorder %s2297_s29, %s3170_s0  ;;  %p3176_p8 = scmp.lt.s32.totalorder %s3170_s0, %s3170_s0 }
 0x5b2   :  { %2698 = vmatpush3.bf16.msra.mxu1 %v4389_v41  ;;  %v4394_v41 = vld [vmem:[#allocation28_spill] sm:$0xff]  ;;  %p3177_p9 = por %p3176_p8, %p3175_p7 }
 0x5b3   :  { %2699 = vmatprep.subr.bf16.mxu1 %v1976_v26  ;;  %v4131_v26 = vld [vmem:[%s4217_s8] ss:$0 sm:$0xff] }
 0x5b4   :  { %p3178_p10 = pnand %p3177_p9, %p3171_p6 }
 0x5b6   :  { %2700 = vmatpush3.bf16.msra.mxu1 %v4392_v32 }
 0x5b9   :  { %2017 = vmatmul.mubr.bf16.vlgmr.msra.gmra.mxu1 %v3060_v50 }
 0x5ba   :  { %2024 = vmatprep.mubr.bf16.mxu1 %v3061_v36 }
 0x5c1   :  { %2025 = vmatmul.mubr.bf16.gmra.mxu1 %v3062_v14  ;;  %v4395_v14 = vld [vmem:[#allocation27_spill] sm:$0xff] }
 0x5c2   :  { %2032 = vmatprep.mubr.bf16.mxu1 %v3063_v33 }
 0x5c9   :  { %2033 = vmatmul.mubr.bf16.gmra.mxu1 %v3064_v49 }
 0x5ca   :  { %2040 = vmatprep.mubr.bf16.mxu1 %v3065_v53 }
 0x5d1   :  { %2041 = vmatmul.mubr.bf16.gmra.mxu1 %v3066_v55 }
 0x5d2   :  { %2048 = vmatprep.mubr.bf16.mxu1 %v4393_v18 }
 0x5d9   :  { %2049 = vmatmul.mubr.bf16.gmra.mxu1 %v3067_v37 }
 0x5da   :  { %2056 = vmatprep.mubr.bf16.mxu1 %v3068_v30 }
 0x5e1   :  { %2057 = vmatmul.mubr.bf16.gmra.mxu1 %v3069_v46 }
 0x5e2   :  { %2064 = vmatprep.mubr.bf16.mxu1 %v3070_v44 }
 0x5e9   :  { %2065 = vmatmul.mubr.bf16.gmra.mxu1 %v3071_v52 }
 0x5ea   :  { %2072 = vmatprep.mubr.bf16.mxu1 %v3072_v39 }
 0x5f1   :  { %2073 = vmatmul.mubr.bf16.gmra.mxu1 %v3073_v7 }
 0x5f2   :  { %2080 = vmatprep.mubr.bf16.mxu1 %v3074_v31 }
 0x5f9   :  { %2081 = vmatmul.mubr.bf16.gmra.mxu1 %v3075_v48 }
 0x5fa   :  { %2088 = vmatprep.mubr.bf16.mxu1 %v3076_v29 }
 0x601   :  { %2089 = vmatmul.mubr.bf16.gmra.mxu1 %v3077_v8 }
 0x602   :  { %2096 = vmatprep.mubr.bf16.mxu1 %v3078_v35 }
 0x609   :  { %2097 = vmatmul.mubr.bf16.gmra.mxu1 %v3079_v47 }
 0x60a   :  { %2104 = vmatprep.mubr.bf16.mxu1 %v3080_v45 }
 0x611   :  { %2105 = vmatmul.mubr.bf16.gmra.mxu1 %v3081_v21 }
 0x612   :  { %2112 = vmatprep.mubr.bf16.mxu1 %v3082_v13 }
 0x619   :  { %2113 = vmatmul.mubr.bf16.gmra.mxu1 %v3083_v27 }
 0x61a   :  { %2120 = vmatprep.mubr.bf16.mxu1 %v3084_v17 }
 0x621   :  { %2121 = vmatmul.mubr.bf16.gmra.mxu1 %v3085_v34 }
 0x622   :  { %2128 = vmatprep.mubr.bf16.mxu1 %v3086_v10 }
 0x629   :  { %2129 = vmatmul.mubr.bf16.gmra.mxu1 %v3087_v24 }
 0x62a   :  { %2136 = vmatprep.mubr.bf16.mxu1 %v3088_v25 }
 0x631   :  { %2137 = vmatmul.mubr.bf16.gmra.mxu1 %v3089_v40 }
 0x679   :  { %v2701_v22 = vpop.f32.mrf.mxu1 }
 0x67b   :  { %v2702_v42 = vpop.f32.mrf.mxu1 }
 0x67c   :  { %v2703_v38 = vadd.f32 %v2702_v42, %v2701_v22 }
 0x67d   :  { %v2704_v56 = vpop.f32.mrf.mxu1 }
 0x67e   :  { %v2145_v43 = vmul.f32 %v2703_v38, %v4394_v41 }
 0x67f   :  { %v2705_v28 = vpop.f32.mrf.mxu1 }
 0x680   :  { %v2183_v32 = vadd.f32 %v4131_v26, %v2145_v43  ;;  %v2706_v50 = vadd.f32 %v2705_v28, %v2704_v56 }
 0x681   :  { %v2707_v36 = vpop.f32.mrf.mxu1 }
 0x682   :  { %2215 = vst [vmem:[#allocation10] sm:$0xff] %v2183_v32  ;;  %v2146_v33 = vmul.f32 %v2706_v50, %v4395_v14 }
 0x683   :  { %3181 = shalt.err (!%p3178_p10)
}
 0x684   :  { %s3228_s8 = smov 128   ;;  %s3229_s30 = smov 8   ;;  %v2708_v49 = vpop.f32.mrf.mxu1  ;;  %v2184_v53 = vadd.f32 %v4131_v26, %v2146_v33  ;;  %v4396_v37 = vld [vmem:[#allocation24_spill] sm:$0xff]  ;;  %v4397_v7 = vld [vmem:[#allocation25_spill] sm:$0xff]  ;;  %v4398_v47 = vld [vmem:[#allocation22_spill] sm:$0xff] }
 0x685   :  { %2302 = dma.vmem_to_hbm [thread:$0]  %s2297_s29, 4096, %s4219_s10, [#allocation12], %s3228_s8, %s3228_s8, %s3229_s30   ;;  %v2709_v55 = vadd.f32 %v2708_v49, %v2707_v36  ;;  %v4399_v34 = vld [vmem:[#allocation23_spill] sm:$0xff]  ;;  %v4400_v42 = vld [vmem:[#allocation20_spill] sm:$0xff]  ;;  %v4401_v32 = vld [vmem:[#allocation21_spill] sm:$0xff] }
 0x686   :  { %v2710_v18 = vpop.f32.mrf.mxu1  ;;  %2216 = vst [vmem:[#allocation10 + $0x8] sm:$0xff] %v2184_v53  ;;  %s3230_s10 = smov [#allocation10]  }
 0x687   :  { %v2147_v30 = vmul.f32 %v2709_v55, %v4396_v37  ;;  %s2284_s12 = sshll.u32 %s3230_s10, 4  ;;  %s2285_s12 = int_to_ptr.vmem [resolvable:$true] %s2284_s12 }
 0x688   :  { %v2711_v46 = vpop.f32.mrf.mxu1  ;;  %s3190_s5 = scalar_lea.vmem %s2285_s12, 4096  ;;  %p3195_p12 = scmp.lt.s32.totalorder %s2285_s12, %s2285_s12 }
 0x689   :  { %v2185_v44 = vadd.f32 %v4131_v26, %v2147_v30  ;;  %v2712_v52 = vadd.f32 %v2711_v46, %v2710_v18  ;;  %p3191_p11 = scmp.ne.s32.totalorder %s2285_s12, %s3190_s5  ;;  %p3196_p13 = scmp.lt.s32.totalorder %s3190_s5, %s3190_s5 }
 0x68a   :  { %v2713_v39 = vpop.f32.mrf.mxu1 }
 0x68b   :  { %2217 = vst [vmem:[#allocation10 + $0x10] sm:$0xff] %v2185_v44  ;;  %v2148_v31 = vmul.f32 %v2712_v52, %v4397_v7  ;;  %p3197_p0 = por %p3196_p13, %p3195_p12 }
 0x68c   :  { %v2714_v48 = vpop.f32.mrf.mxu1 }
 0x68d   :  { %v2186_v29 = vadd.f32 %v4131_v26, %v2148_v31  ;;  %v2715_v8 = vadd.f32 %v2714_v48, %v2713_v39  ;;  %p3198_p1 = pnand %p3197_p0, %p3191_p11 }
 0x68e   :  { %v2716_v35 = vpop.f32.mrf.mxu1 }
 0x68f   :  { %2218 = vst [vmem:[#allocation10 + $0x18] sm:$0xff] %v2186_v29  ;;  %v2149_v45 = vmul.f32 %v2715_v8, %v4398_v47 }
 0x690   :  { %v2717_v21 = vpop.f32.mrf.mxu1 }
 0x691   :  { %v2187_v13 = vadd.f32 %v4131_v26, %v2149_v45  ;;  %v2718_v27 = vadd.f32 %v2717_v21, %v2716_v35 }
 0x692   :  { %v2719_v17 = vpop.f32.mrf.mxu1 }
 0x693   :  { %2219 = vst [vmem:[#allocation10 + $0x20] sm:$0xff] %v2187_v13  ;;  %v2150_v10 = vmul.f32 %v2718_v27, %v4399_v34 }
 0x694   :  { %v2720_v24 = vpop.f32.mrf.mxu1 }
 0x695   :  { %v2188_v25 = vadd.f32 %v4131_v26, %v2150_v10  ;;  %v2721_v40 = vadd.f32 %v2720_v24, %v2719_v17 }
 0x696   :  { %v2722_v22 = vpop.f32.mrf.mxu1 }
 0x697   :  { %2220 = vst [vmem:[#allocation10 + $0x28] sm:$0xff] %v2188_v25  ;;  %v2151_v38 = vmul.f32 %v2721_v40, %v4400_v42 }
 0x698   :  { %v2723_v56 = vpop.f32.mrf.mxu1 }
 0x699   :  { %v2189_v41 = vadd.f32 %v4131_v26, %v2151_v38  ;;  %v2724_v43 = vadd.f32 %v2723_v56, %v2722_v22 }
 0x69a   :  { %v2725_v28 = vpop.f32.mrf.mxu1 }
 0x69b   :  { %2221 = vst [vmem:[#allocation10 + $0x30] sm:$0xff] %v2189_v41  ;;  %v2152_v50 = vmul.f32 %v2724_v43, %v4401_v32 }
 0x69c   :  { %v2726_v36 = vpop.f32.mrf.mxu1 }
 0x69d   :  { %v2190_v14 = vadd.f32 %v4131_v26, %v2152_v50  ;;  %v2727_v33 = vadd.f32 %v2726_v36, %v2725_v28 }
 0x69e   :  { %v2728_v49 = vpop.f32.mrf.mxu1 }
 0x69f   :  { %2222 = vst [vmem:[#allocation10 + $0x38] sm:$0xff] %v2190_v14  ;;  %v2153_v53 = vmul.f32 %v2727_v33, %v3442_v9 }
 0x6a0   :  { %v2729_v55 = vpop.f32.mrf.mxu1 }
 0x6a1   :  { %v2191_v18 = vadd.f32 %v4131_v26, %v2153_v53  ;;  %v2730_v37 = vadd.f32 %v2729_v55, %v2728_v49 }
 0x6a2   :  { %v2731_v30 = vpop.f32.mrf.mxu1 }
 0x6a3   :  { %2223 = vst [vmem:[#allocation10 + $0x40] sm:$0xff] %v2191_v18  ;;  %v2154_v46 = vmul.f32 %v2730_v37, %v4337_v23 }
 0x6a4   :  { %v2732_v44 = vpop.f32.mrf.mxu1 }
 0x6a5   :  { %v2192_v52 = vadd.f32 %v4131_v26, %v2154_v46  ;;  %v2733_v39 = vadd.f32 %v2732_v44, %v2731_v30 }
 0x6a6   :  { %v2734_v7 = vpop.f32.mrf.mxu1 }
 0x6a7   :  { %2224 = vst [vmem:[#allocation10 + $0x48] sm:$0xff] %v2192_v52  ;;  %v2155_v31 = vmul.f32 %v2733_v39, %v3426_v3 }
 0x6a8   :  { %v2735_v48 = vpop.f32.mrf.mxu1 }
 0x6a9   :  { %v2193_v29 = vadd.f32 %v4131_v26, %v2155_v31  ;;  %v2736_v9 = vadd.f32 %v2735_v48, %v2734_v7 }
 0x6aa   :  { %v2737_v8 = vpop.f32.mrf.mxu1 }
 0x6ab   :  { %2225 = vst [vmem:[#allocation10 + $0x50] sm:$0xff] %v2193_v29  ;;  %v2156_v35 = vmul.f32 %v2736_v9, %v3428_v4 }
 0x6ac   :  { %v2738_v47 = vpop.f32.mrf.mxu1 }
 0x6ad   :  { %v2194_v45 = vadd.f32 %v4131_v26, %v2156_v35  ;;  %v2739_v23 = vadd.f32 %v2738_v47, %v2737_v8 }
 0x6ae   :  { %v2740_v21 = vpop.f32.mrf.mxu1 }
 0x6af   :  { %2226 = vst [vmem:[#allocation10 + $0x58] sm:$0xff] %v2194_v45  ;;  %v2157_v13 = vmul.f32 %v2739_v23, %v3418_v63 }
 0x6b0   :  { %v2741_v27 = vpop.f32.mrf.mxu1 }
 0x6b1   :  { %v2195_v17 = vadd.f32 %v4131_v26, %v2157_v13  ;;  %v2742_v3 = vadd.f32 %v2741_v27, %v2740_v21 }
 0x6b2   :  { %v2743_v34 = vpop.f32.mrf.mxu1 }
 0x6b3   :  { %2227 = vst [vmem:[#allocation10 + $0x60] sm:$0xff] %v2195_v17  ;;  %v2158_v10 = vmul.f32 %v2742_v3, %v3420_v0 }
 0x6b4   :  { %v2744_v24 = vpop.f32.mrf.mxu1 }
 0x6b5   :  { %v2196_v25 = vadd.f32 %v4131_v26, %v2158_v10  ;;  %v2745_v4 = vadd.f32 %v2744_v24, %v2743_v34 }
 0x6b6   :  { %v2746_v40 = vpop.f32.mrf.mxu1 }
 0x6b7   :  { %2228 = vst [vmem:[#allocation10 + $0x68] sm:$0xff] %v2196_v25  ;;  %v2159_v22 = vmul.f32 %v2745_v4, %v3408_v58 }
 0x6b8   :  { %v2747_v42 = vpop.f32.mrf.mxu1 }
 0x6b9   :  { %v2197_v38 = vadd.f32 %v4131_v26, %v2159_v22  ;;  %v2748_v63 = vadd.f32 %v2747_v42, %v2746_v40 }
 0x6ba   :  { %v2749_v56 = vpop.f32.mrf.mxu1 }
 0x6bb   :  { %2229 = vst [vmem:[#allocation10 + $0x70] sm:$0xff] %v2197_v38  ;;  %v2160_v41 = vmul.f32 %v2748_v63, %v3412_v60 }
 0x6bc   :  { %v2750_v43 = vpop.f32.mrf.mxu1 }
 0x6bd   :  { %v2198_v28 = vadd.f32 %v4131_v26, %v2160_v41  ;;  %v2751_v0 = vadd.f32 %v2750_v43, %v2749_v56 }
 0x6be   :  { %v2752_v32 = vpop.f32.mrf.mxu1 }
 0x6bf   :  { %2230 = vst [vmem:[#allocation10 + $0x78] sm:$0xff] %v2198_v28  ;;  %v2161_v50 = vmul.f32 %v2751_v0, %v3519_v51 }
 0x6c0   :  { %v2753_v36 = vpop.f32.mrf.mxu1 }
 0x6c1   :  { %v2199_v14 = vadd.f32 %v4131_v26, %v2161_v50  ;;  %v2754_v58 = vadd.f32 %v2753_v36, %v2752_v32 }
 0x6c2   :  { %v2755_v33 = vpop.f32.mrf.mxu1 }
 0x6c3   :  { %2231 = vst [vmem:[#allocation10 + $0x80] sm:$0xff] %v2199_v14  ;;  %v2162_v49 = vmul.f32 %v2754_v58, %v3514_v54 }
 0x6c4   :  { %v2756_v53 = vpop.f32.mrf.mxu1 }
 0x6c5   :  { %v2200_v55 = vadd.f32 %v4131_v26, %v2162_v49  ;;  %v2757_v60 = vadd.f32 %v2756_v53, %v2755_v33 }
 0x6c6   :  { %v2758_v18 = vpop.f32.mrf.mxu1 }
 0x6c7   :  { %2232 = vst [vmem:[#allocation10 + $0x88] sm:$0xff] %v2200_v55  ;;  %v2163_v37 = vmul.f32 %v2757_v60, %v3463_v19 }
 0x6c8   :  { %v2759_v30 = vpop.f32.mrf.mxu1 }
 0x6c9   :  { %v2201_v46 = vadd.f32 %v4131_v26, %v2163_v37  ;;  %v2760_v51 = vadd.f32 %v2759_v30, %v2758_v18 }
 0x6ca   :  { %v2761_v44 = vpop.f32.mrf.mxu1 }
 0x6cb   :  { %2233 = vst [vmem:[#allocation10 + $0x90] sm:$0xff] %v2201_v46  ;;  %v2164_v52 = vmul.f32 %v2760_v51, %v3465_v20 }
 0x6cc   :  { %v2762_v39 = vpop.f32.mrf.mxu1 }
 0x6cd   :  { %v2202_v7 = vadd.f32 %v4131_v26, %v2164_v52  ;;  %v2763_v54 = vadd.f32 %v2762_v39, %v2761_v44 }
 0x6ce   :  { %v2764_v31 = vpop.f32.mrf.mxu1 }
 0x6cf   :  { %2234 = vst [vmem:[#allocation10 + $0x98] sm:$0xff] %v2202_v7  ;;  %v2165_v48 = vmul.f32 %v2763_v54, %v3455_v15 }
 0x6d0   :  { %v2765_v29 = vpop.f32.mrf.mxu1 }
 0x6d1   :  { %v2203_v9 = vadd.f32 %v4131_v26, %v2165_v48  ;;  %v2766_v19 = vadd.f32 %v2765_v29, %v2764_v31 }
 0x6d2   :  { %v2767_v8 = vpop.f32.mrf.mxu1 }
 0x6d3   :  { %2235 = vst [vmem:[#allocation10 + $0xa0] sm:$0xff] %v2203_v9  ;;  %v2166_v35 = vmul.f32 %v2766_v19, %v3457_v16 }
 0x6d4   :  { %v2768_v47 = vpop.f32.mrf.mxu1 }
 0x6d5   :  { %v2204_v45 = vadd.f32 %v4131_v26, %v2166_v35  ;;  %v2769_v20 = vadd.f32 %v2768_v47, %v2767_v8 }
 0x6d6   :  { %v2770_v23 = vpop.f32.mrf.mxu1 }
 0x6d7   :  { %2236 = vst [vmem:[#allocation10 + $0xa8] sm:$0xff] %v2204_v45  ;;  %v2167_v21 = vmul.f32 %v2769_v20, %v3447_v11 }
 0x6d8   :  { %v2771_v13 = vpop.f32.mrf.mxu1 }
 0x6d9   :  { %v2205_v27 = vadd.f32 %v4131_v26, %v2167_v21  ;;  %v2772_v15 = vadd.f32 %v2771_v13, %v2770_v23 }
 0x6da   :  { %v2773_v17 = vpop.f32.mrf.mxu1 }
 0x6db   :  { %2237 = vst [vmem:[#allocation10 + $0xb0] sm:$0xff] %v2205_v27  ;;  %v2168_v3 = vmul.f32 %v2772_v15, %v3449_v12 }
 0x6dc   :  { %v2774_v34 = vpop.f32.mrf.mxu1 }
 0x6dd   :  { %v2206_v10 = vadd.f32 %v4131_v26, %v2168_v3  ;;  %v2775_v16 = vadd.f32 %v2774_v34, %v2773_v17 }
 0x6de   :  { %v2776_v24 = vpop.f32.mrf.mxu1 }
 0x6df   :  { %2238 = vst [vmem:[#allocation10 + $0xb8] sm:$0xff] %v2206_v10  ;;  %v2169_v25 = vmul.f32 %v2775_v16, %v3430_v5 }
 0x6e0   :  { %v2777_v4 = vpop.f32.mrf.mxu1 }
 0x6e1   :  { %v2207_v40 = vadd.f32 %v4131_v26, %v2169_v25  ;;  %v2778_v11 = vadd.f32 %v2777_v4, %v2776_v24 }
 0x6e2   :  { %v2779_v22 = vpop.f32.mrf.mxu1 }
 0x6e3   :  { %2239 = vst [vmem:[#allocation10 + $0xc0] sm:$0xff] %v2207_v40  ;;  %v2170_v42 = vmul.f32 %v2778_v11, %v3432_v6 }
 0x6e4   :  { %v2780_v38 = vpop.f32.mrf.mxu1 }
 0x6e5   :  { %v2208_v63 = vadd.f32 %v4131_v26, %v2170_v42  ;;  %v2781_v12 = vadd.f32 %v2780_v38, %v2779_v22 }
 0x6e6   :  { %v2782_v56 = vpop.f32.mrf.mxu1 }
 0x6e7   :  { %2240 = vst [vmem:[#allocation10 + $0xc8] sm:$0xff] %v2208_v63  ;;  %v2171_v41 = vmul.f32 %v2781_v12, %v3422_v1 }
 0x6e8   :  { %v2783_v43 = vpop.f32.mrf.mxu1 }
 0x6e9   :  { %v2209_v28 = vadd.f32 %v4131_v26, %v2171_v41  ;;  %v2784_v5 = vadd.f32 %v2783_v43, %v2782_v56 }
 0x6ea   :  { %v2785_v0 = vpop.f32.mrf.mxu1 }
 0x6eb   :  { %2241 = vst [vmem:[#allocation10 + $0xd0] sm:$0xff] %v2209_v28  ;;  %v2172_v32 = vmul.f32 %v2784_v5, %v3424_v2 }
 0x6ec   :  { %v2786_v50 = vpop.f32.mrf.mxu1 }
 0x6ed   :  { %v2210_v36 = vadd.f32 %v4131_v26, %v2172_v32  ;;  %v2787_v6 = vadd.f32 %v2786_v50, %v2785_v0 }
 0x6ee   :  { %v2788_v14 = vpop.f32.mrf.mxu1 }
 0x6ef   :  { %2242 = vst [vmem:[#allocation10 + $0xd8] sm:$0xff] %v2210_v36  ;;  %v2173_v58 = vmul.f32 %v2787_v6, %v3414_v61 }
 0x6f0   :  { %v2789_v33 = vpop.f32.mrf.mxu1 }
 0x6f1   :  { %v2211_v49 = vadd.f32 %v4131_v26, %v2173_v58  ;;  %v2790_v1 = vadd.f32 %v2789_v33, %v2788_v14 }
 0x6f2   :  { %v2791_v53 = vpop.f32.mrf.mxu1 }
 0x6f3   :  { %2243 = vst [vmem:[#allocation10 + $0xe0] sm:$0xff] %v2211_v49  ;;  %v2174_v55 = vmul.f32 %v2790_v1, %v3416_v62 }
 0x6f4   :  { %v2792_v60 = vpop.f32.mrf.mxu1 }
 0x6f5   :  { %v2212_v18 = vadd.f32 %v4131_v26, %v2174_v55  ;;  %v2793_v2 = vadd.f32 %v2792_v60, %v2791_v53 }
 0x6f6   :  { %v2794_v37 = vpop.f32.mrf.mxu1 }
 0x6f7   :  { %2244 = vst [vmem:[#allocation10 + $0xe8] sm:$0xff] %v2212_v18  ;;  %v2175_v30 = vmul.f32 %v2793_v2, %v3406_v57 }
 0x6f8   :  { %v2795_v46 = vpop.f32.mrf.mxu1 }
 0x6f9   :  { %v2213_v51 = vadd.f32 %v4131_v26, %v2175_v30  ;;  %v2796_v61 = vadd.f32 %v2795_v46, %v2794_v37 }
 0x6fb   :  { %2245 = vst [vmem:[#allocation10 + $0xf0] sm:$0xff] %v2213_v51  ;;  %v2176_v44 = vmul.f32 %v2796_v61, %v3410_v59 }
 0x6fd   :  { %v2214_v52 = vadd.f32 %v4131_v26, %v2176_v44 }
 0x6ff   :  { %2246 = vst [vmem:[#allocation10 + $0xf8] sm:$0xff] %v2214_v52 }
 0x700   :  { %3201 = shalt.err (!%p3198_p1)
}
 0x701   :  { %2290 = dma.vmem_to_hbm [thread:$0]  %s2285_s12, 4096, %s4218_s9, [#allocation4], %s3228_s8, %s3228_s8, %s3229_s30  }
 0x702   :  { %3216 = dma.done.wait [#allocation4], 4096  }
 0x703   :  { %3217 = vsyncadd [#allocation4], 4294963200 }
 0x704   :  { %3218 = dma.done.wait [#allocation12], 4096  }
 0x705   :  { %3219 = vsyncadd [#allocation12], 4294963200 }
 0x706   :  { %2309 = vsyncpa [#allocation3], 1 }
 0x707   :  { %2310 = vsyncpa [#allocation6], 1 }
 0x708   :  { %2311 = vsyncpa [#allocation9], 1 }
 0x709   :  { %2312 = vsyncpa [#allocation4], 1 }
 0x70a   :  { %2313 = vsyncpa [#allocation12], 1 }

</bundles_post_ra>
